<compile_context>
chip_gen: v5e
topology: v5e:2x2
jax: 0.10.0
libtpu: 0.0.40
codegen_flags: <defaults>
</compile_context>

<pallas_src>
import math
from functools import partial

import jax
import jax.numpy as jnp
from jax import lax
from jax.experimental import pallas as pl
from jax.experimental.pallas import tpu as pltpu


# ----------------------------- in-kernel helpers -----------------------------

def _layer_norm(x, eps=1e-5):
    mu = jnp.mean(x, axis=-1, keepdims=True)
    var = jnp.mean((x - mu) ** 2, axis=-1, keepdims=True)
    return (x - mu) * lax.rsqrt(var + eps)


def _bmm_nt(a, b):
    """[H, M, K] x [H, N, K] -> [H, M, N] (contract last dims), f32 accumulation."""
    return lax.dot_general(a, b, (((2,), (2,)), ((0,), (0,))),
                           preferred_element_type=jnp.float32)


def _bmm_nn(a, b):
    """[H, M, K] x [H, K, N] -> [H, M, N], f32 accumulation."""
    return lax.dot_general(a, b, (((2,), (1,)), ((0,), (0,))),
                           preferred_element_type=jnp.float32)


def _mha(q_in, kv_in, wq, bq, wk, bk, wv, bv, wo, bo, *, nheads):
    """Multi-head attention on 2-D tiles for one batch element.

    q_in:  [Sq, D] bf16    kv_in: [Sk, D] bf16
    wq/wk/wv/wo: [H, hd, D] bf16  (lane dim = D: no lane padding of weights)
    bq/bk/bv: [H, 1, hd] f32      bo: [1, D] f32
    """
    H = nheads
    Sq, D = q_in.shape
    Sk = kv_in.shape[0]
    hd = wq.shape[1]
    scale = 1.0 / math.sqrt(hd)

    # Head-batched projections; contraction K = D (full hidden) per pass.
    q_b = jnp.broadcast_to(q_in[None], (H, Sq, D))
    kv_b = jnp.broadcast_to(kv_in[None], (H, Sk, D))
    q = _bmm_nt(q_b, wq) + bq          # [H, Sq, hd] f32
    k = _bmm_nt(kv_b, wk) + bk         # [H, Sk, hd] f32
    v = _bmm_nt(kv_b, wv) + bv         # [H, Sk, hd] f32

    # scores [H, Sq, Sk]  (no mask: module default mask=None)
    s = _bmm_nt(q.astype(jnp.bfloat16), k.astype(jnp.bfloat16)) * scale
    s = s - jnp.max(s, axis=-1, keepdims=True)
    p = jnp.exp(s)
    # TODO(synk): approx reciprocal -> tiny relative error vs exact softmax.
    p = p * pl.reciprocal(jnp.sum(p, axis=-1, keepdims=True), approx=True)

    ctx = _bmm_nn(p.astype(jnp.bfloat16), v.astype(jnp.bfloat16))   # [H, Sq, hd]
    out = _bmm_nn(ctx.astype(jnp.bfloat16), wo)                     # [H, Sq, D]
    return jnp.sum(out, axis=0) + bo                                # [Sq, D]


# --------------------------------- the kernel --------------------------------

def _decoder_stack_kernel(
    x_ref,        # [1, S_dec, D] f32
    enc_ref,      # [1, S_enc, D] bf16 (pre-cast in wrapper)
    w_qkv_ref,    # [L, 6, H, hd, D] bf16 : self q,k,v then cross q,k,v
    b_qkv_ref,    # [L, 6, H, 1, hd] f32
    w_out_ref,    # [L, 2, H, hd, D] bf16 : self wo, cross wo
    b_out_ref,    # [L, 2, 1, D] f32
    w1_ref, b1_ref, w2_ref, b2_ref,   # FFN: [L,D,F], [L,1,F], [L,F,D], [L,1,D]
    o_ref,        # [1, S_dec, D]
    *, nheads, n_layers):
    enc = enc_ref[0]                        # [S_enc, D] bf16, MXU operand only
    x0 = x_ref[0].astype(jnp.float32)       # [S_dec, D] f32

    def layer_body(l, x):
        wqkv = w_qkv_ref[l]                 # [6, H, hd, D] bf16
        bqkv = b_qkv_ref[l]                 # [6, H, 1, hd] f32
        wo2 = w_out_ref[l]                  # [2, H, hd, D] bf16
        bo2 = b_out_ref[l]                  # [2, 1, D] f32

        # --- self attention + add & norm ---
        x_bf = x.astype(jnp.bfloat16)
        sa = _mha(x_bf, x_bf,
                  wqkv[0], bqkv[0], wqkv[1], bqkv[1], wqkv[2], bqkv[2],
                  wo2[0], bo2[0], nheads=nheads)
        h1 = _layer_norm(x + sa)

        # --- cross attention + add & norm ---
        ca = _mha(h1.astype(jnp.bfloat16), enc,
                  wqkv[3], bqkv[3], wqkv[4], bqkv[4], wqkv[5], bqkv[5],
                  wo2[1], bo2[1], nheads=nheads)
        h2 = _layer_norm(h1 + ca)

        # --- feed forward (Linear -> ReLU -> Linear) + add & norm ---
        hid = jnp.dot(h2.astype(jnp.bfloat16), w1_ref[l],
                      preferred_element_type=jnp.float32) + b1_ref[l]
        hid = jnp.maximum(hid, 0.0)
        ff = jnp.dot(hid.astype(jnp.bfloat16), w2_ref[l],
                     preferred_element_type=jnp.float32) + b2_ref[l]
        return _layer_norm(h2 + ff)

    x_out = lax.fori_loop(0, n_layers, layer_body, x0)
    o_ref[0] = x_out.astype(o_ref.dtype)


# --------------------------------- wrapper ------------------------------------

_WEIGHT_KEYS = ("w_attn_qkv", "b_attn_qkv", "w_attn_out", "b_attn_out",
                "w1", "b1", "w2", "b2")


def transformer_decoder(x, enc, params, nheads):
    """Full decoder stack in one pallas_call. x: [B, S_dec, D], enc: [B, S_enc, D]."""
    B, S_dec, D = x.shape
    _, S_enc, _ = enc.shape
    L = params["w_attn_qkv"].shape[0]

    weights = [params[k] for k in _WEIGHT_KEYS]
    enc_bf16 = enc.astype(jnp.bfloat16)     # enc is only ever an MXU operand

    def resident_spec(arr):
        # Whole [L, ...] array resident in VMEM; constant block index across the
        # batch grid => DMA'd once, never re-streamed per batch element.
        nd = arr.ndim
        return pl.BlockSpec(arr.shape, lambda b, _nd=nd: (0,) * _nd)

    in_specs = (
        [pl.BlockSpec((1, S_dec, D), lambda b: (b, 0, 0)),
         pl.BlockSpec((1, S_enc, D), lambda b: (b, 0, 0))]
        + [resident_spec(w) for w in weights]
    )

    return pl.pallas_call(
        partial(_decoder_stack_kernel, nheads=nheads, n_layers=L),
        out_shape=jax.ShapeDtypeStruct((B, S_dec, D), x.dtype),
        grid_spec=pltpu.PrefetchScalarGridSpec(
            num_scalar_prefetch=0,
            grid=(B,),                       # batch only; layers looped in-kernel
            in_specs=in_specs,
            out_specs=pl.BlockSpec((1, S_dec, D), lambda b: (b, 0, 0)),
        ),
        compiler_params=pltpu.CompilerParams(
            dimension_semantics=("parallel",),   # B=2 -> both v7x TCs get work
            vmem_limit_bytes=32 * 1024 * 1024,   # also within v7x's 64 MiB budget
        ),
    )(x, enc_bf16, *weights)


# ----------------------------- parameter packing -------------------------------

def _xavier(key, shape):
    fan_in, fan_out = shape
    limit = math.sqrt(6.0 / (fan_in + fan_out))
    return jax.random.uniform(key, shape, jnp.float32, -limit, limit)


def init_stacked_params(key, n_layers, d, ffn_d, nheads):
    hd = d // nheads

    def in_proj(w):
        # [D_in, D_out] -> [H, hd, D_in]: lane dim = D (wide); NT contraction in kernel.
        return w.T.reshape(nheads, hd, d)

    def out_proj(w):
        # [D_in(=H*hd head-major), D_out] -> [H, hd, D_out]: lane dim = D (wide).
        return w.reshape(nheads, hd, d)

    qkv_l, out_l, w1_l, w2_l = [], [], [], []
    for lk in jax.random.split(key, n_layers):
        ks = jax.random.split(lk, 10)
        s_wq, s_wk, s_wv, s_wo, c_wq, c_wk, c_wv, c_wo = [
            _xavier(ks[i], (d, d)) for i in range(8)]
        w1 = _xavier(ks[8], (d, ffn_d))
        w2 = _xavier(ks[9], (ffn_d, d))
        qkv_l.append(jnp.stack([in_proj(s_wq), in_proj(s_wk), in_proj(s_wv),
                                in_proj(c_wq), in_proj(c_wk), in_proj(c_wv)]))
        out_l.append(jnp.stack([out_proj(s_wo), out_proj(c_wo)]))
        w1_l.append(w1)
        w2_l.append(w2)

    return {
        # MXU operands stored bf16; biases kept f32 (elementwise path).
        "w_attn_qkv": jnp.stack(qkv_l).astype(jnp.bfloat16),       # [L, 6, H, hd, D]
        "b_attn_qkv": jnp.zeros((n_layers, 6, nheads, 1, hd), jnp.float32),
        "w_attn_out": jnp.stack(out_l).astype(jnp.bfloat16),       # [L, 2, H, hd, D]
        "b_attn_out": jnp.zeros((n_layers, 2, 1, d), jnp.float32),
        "w1": jnp.stack(w1_l).astype(jnp.bfloat16),                # [L, D, F]
        "b1": jnp.zeros((n_layers, 1, ffn_d), jnp.float32),
        "w2": jnp.stack(w2_l).astype(jnp.bfloat16),                # [L, F, D]
        "b2": jnp.zeros((n_layers, 1, d), jnp.float32),
    }


# ----------------------------------- main --------------------------------------

if __name__ == "__main__":
    B, S_DEC, S_ENC = 2, 8, 8
    D, FFN_D, NHEADS = 32, 64, 4
    N_LAYERS = 2   # small stack for the test (module default is 6)

    root = jax.random.PRNGKey(0)
    kx, kenc, kp = jax.random.split(root, 3)
    x = jax.random.normal(kx, (B, S_DEC, D), jnp.float32)
    enc = jax.random.normal(kenc, (B, S_ENC, D), jnp.float32)

    params = init_stacked_params(kp, N_LAYERS, D, FFN_D, NHEADS)

    out = transformer_decoder(x, enc, params, NHEADS)
    out = jax.block_until_ready(out)
    assert out.shape == (B, S_DEC, D)
    assert bool(jnp.all(jnp.isfinite(out)))
    print("KERNEL_OK")
</pallas_src>

<mosaic_0001>
module attributes {stable_mosaic.version = 11 : i64} {
  func.func @_decoder_stack_kernel(%arg0: i32, %arg1: memref<1x8x32xf32, #tpu.memory_space<vmem>>, %arg2: memref<1x8x32xbf16, #tpu.memory_space<vmem>>, %arg3: memref<2x6x4x8x32xbf16, #tpu.memory_space<vmem>>, %arg4: memref<2x6x4x1x8xf32, #tpu.memory_space<vmem>>, %arg5: memref<2x2x4x8x32xbf16, #tpu.memory_space<vmem>>, %arg6: memref<2x2x1x32xf32, #tpu.memory_space<vmem>>, %arg7: memref<2x32x64xbf16, #tpu.memory_space<vmem>>, %arg8: memref<2x1x64xf32, #tpu.memory_space<vmem>>, %arg9: memref<2x64x32xbf16, #tpu.memory_space<vmem>>, %arg10: memref<2x1x32xf32, #tpu.memory_space<vmem>>, %arg11: memref<1x8x32xf32, #tpu.memory_space<vmem>>) attributes {dimension_semantics = [#tpu.dimension_semantics<parallel>], iteration_bounds = array<i64: 2>, scalar_prefetch = 0 : i64, scratch_operands = 0 : i64, tpu.core_type = #tpu.core_type<tc>, window_params = [{transform_indices = @transform_0, window_bounds = array<i64: 1, 8, 32>}, {transform_indices = @transform_1, window_bounds = array<i64: 1, 8, 32>}, {pipeline_mode = #tpu.pipeline_mode<synchronous>, transform_indices = @transform_2, window_bounds = array<i64: 2, 6, 4, 8, 32>}, {pipeline_mode = #tpu.pipeline_mode<synchronous>, transform_indices = @transform_3, window_bounds = array<i64: 2, 6, 4, 1, 8>}, {pipeline_mode = #tpu.pipeline_mode<synchronous>, transform_indices = @transform_4, window_bounds = array<i64: 2, 2, 4, 8, 32>}, {pipeline_mode = #tpu.pipeline_mode<synchronous>, transform_indices = @transform_5, window_bounds = array<i64: 2, 2, 1, 32>}, {pipeline_mode = #tpu.pipeline_mode<synchronous>, transform_indices = @transform_6, window_bounds = array<i64: 2, 32, 64>}, {pipeline_mode = #tpu.pipeline_mode<synchronous>, transform_indices = @transform_7, window_bounds = array<i64: 2, 1, 64>}, {pipeline_mode = #tpu.pipeline_mode<synchronous>, transform_indices = @transform_8, window_bounds = array<i64: 2, 64, 32>}, {pipeline_mode = #tpu.pipeline_mode<synchronous>, transform_indices = @transform_9, window_bounds = array<i64: 2, 1, 32>}, {transform_indices = @transform_10, window_bounds = array<i64: 1, 8, 32>}]} {
    %c0 = arith.constant 0 : index
    %c0_0 = arith.constant 0 : index
    %c0_1 = arith.constant 0 : index
    %0 = vector.load %arg2[%c0, %c0_0, %c0_1] : memref<1x8x32xbf16, #tpu.memory_space<vmem>>, vector<1x8x32xbf16>
    %1 = vector.shape_cast %0 : vector<1x8x32xbf16> to vector<8x32xbf16>
    %c0_2 = arith.constant 0 : index
    %c0_3 = arith.constant 0 : index
    %c0_4 = arith.constant 0 : index
    %2 = vector.load %arg1[%c0_2, %c0_3, %c0_4] : memref<1x8x32xf32, #tpu.memory_space<vmem>>, vector<1x8x32xf32>
    %3 = vector.shape_cast %2 : vector<1x8x32xf32> to vector<8x32xf32>
    %c0_i32 = arith.constant 0 : i32
    %c2_i32 = arith.constant 2 : i32
    %4 = arith.addi %c0_i32, %c2_i32 : i32
    %c1_i32 = arith.constant 1 : i32
    %5 = scf.for %arg12 = %c0_i32 to %4 step %c1_i32 iter_args(%arg13 = %3) -> (vector<8x32xf32>)  : i32 {
      %9 = arith.index_cast %arg12 : i32 to index
      %c0_9 = arith.constant 0 : index
      %c0_10 = arith.constant 0 : index
      %c0_11 = arith.constant 0 : index
      %c0_12 = arith.constant 0 : index
      %10 = vector.load %arg3[%9, %c0_9, %c0_10, %c0_11, %c0_12] : memref<2x6x4x8x32xbf16, #tpu.memory_space<vmem>>, vector<1x6x4x8x32xbf16>
      %11 = vector.shape_cast %10 : vector<1x6x4x8x32xbf16> to vector<6x4x8x32xbf16>
      %12 = arith.index_cast %arg12 : i32 to index
      %c0_13 = arith.constant 0 : index
      %c0_14 = arith.constant 0 : index
      %c0_15 = arith.constant 0 : index
      %c0_16 = arith.constant 0 : index
      %13 = vector.load %arg4[%12, %c0_13, %c0_14, %c0_15, %c0_16] : memref<2x6x4x1x8xf32, #tpu.memory_space<vmem>>, vector<1x6x4x1x8xf32>
      %14 = vector.shape_cast %13 : vector<1x6x4x1x8xf32> to vector<6x4x1x8xf32>
      %15 = arith.index_cast %arg12 : i32 to index
      %c0_17 = arith.constant 0 : index
      %c0_18 = arith.constant 0 : index
      %c0_19 = arith.constant 0 : index
      %c0_20 = arith.constant 0 : index
      %16 = vector.load %arg5[%15, %c0_17, %c0_18, %c0_19, %c0_20] : memref<2x2x4x8x32xbf16, #tpu.memory_space<vmem>>, vector<1x2x4x8x32xbf16>
      %17 = vector.shape_cast %16 : vector<1x2x4x8x32xbf16> to vector<2x4x8x32xbf16>
      %18 = arith.index_cast %arg12 : i32 to index
      %c0_21 = arith.constant 0 : index
      %c0_22 = arith.constant 0 : index
      %c0_23 = arith.constant 0 : index
      %19 = vector.load %arg6[%18, %c0_21, %c0_22, %c0_23] : memref<2x2x1x32xf32, #tpu.memory_space<vmem>>, vector<1x2x1x32xf32>
      %20 = vector.shape_cast %19 : vector<1x2x1x32xf32> to vector<2x1x32xf32>
      %21 = arith.truncf %arg13 : vector<8x32xf32> to vector<8x32xbf16>
      %22 = vector.extract_strided_slice %11 {offsets = [0, 0, 0, 0], sizes = [1, 4, 8, 32], strides = [1, 1, 1, 1]} : vector<6x4x8x32xbf16> to vector<1x4x8x32xbf16>
      %23 = vector.shape_cast %22 : vector<1x4x8x32xbf16> to vector<4x8x32xbf16>
      %24 = vector.extract_strided_slice %14 {offsets = [0, 0, 0, 0], sizes = [1, 4, 1, 8], strides = [1, 1, 1, 1]} : vector<6x4x1x8xf32> to vector<1x4x1x8xf32>
      %25 = vector.shape_cast %24 : vector<1x4x1x8xf32> to vector<4x1x8xf32>
      %26 = vector.extract_strided_slice %11 {offsets = [1, 0, 0, 0], sizes = [1, 4, 8, 32], strides = [1, 1, 1, 1]} : vector<6x4x8x32xbf16> to vector<1x4x8x32xbf16>
      %27 = vector.shape_cast %26 : vector<1x4x8x32xbf16> to vector<4x8x32xbf16>
      %28 = vector.extract_strided_slice %14 {offsets = [1, 0, 0, 0], sizes = [1, 4, 1, 8], strides = [1, 1, 1, 1]} : vector<6x4x1x8xf32> to vector<1x4x1x8xf32>
      %29 = vector.shape_cast %28 : vector<1x4x1x8xf32> to vector<4x1x8xf32>
      %30 = vector.extract_strided_slice %11 {offsets = [2, 0, 0, 0], sizes = [1, 4, 8, 32], strides = [1, 1, 1, 1]} : vector<6x4x8x32xbf16> to vector<1x4x8x32xbf16>
      %31 = vector.shape_cast %30 : vector<1x4x8x32xbf16> to vector<4x8x32xbf16>
      %32 = vector.extract_strided_slice %14 {offsets = [2, 0, 0, 0], sizes = [1, 4, 1, 8], strides = [1, 1, 1, 1]} : vector<6x4x1x8xf32> to vector<1x4x1x8xf32>
      %33 = vector.shape_cast %32 : vector<1x4x1x8xf32> to vector<4x1x8xf32>
      %34 = vector.extract_strided_slice %17 {offsets = [0, 0, 0, 0], sizes = [1, 4, 8, 32], strides = [1, 1, 1, 1]} : vector<2x4x8x32xbf16> to vector<1x4x8x32xbf16>
      %35 = vector.shape_cast %34 : vector<1x4x8x32xbf16> to vector<4x8x32xbf16>
      %36 = vector.extract_strided_slice %20 {offsets = [0, 0, 0], sizes = [1, 1, 32], strides = [1, 1, 1]} : vector<2x1x32xf32> to vector<1x1x32xf32>
      %37 = vector.shape_cast %36 : vector<1x1x32xf32> to vector<1x32xf32>
      %38 = vector.shape_cast %21 : vector<8x32xbf16> to vector<1x8x32xbf16>
      %39 = vector.shape_cast %38 : vector<1x8x32xbf16> to vector<1x8x32xbf16>
      %40 = vector.broadcast %39 : vector<1x8x32xbf16> to vector<4x8x32xbf16>
      %41 = vector.shape_cast %21 : vector<8x32xbf16> to vector<1x8x32xbf16>
      %42 = vector.shape_cast %41 : vector<1x8x32xbf16> to vector<1x8x32xbf16>
      %43 = vector.broadcast %42 : vector<1x8x32xbf16> to vector<4x8x32xbf16>
      %cst = arith.constant dense<0.000000e+00> : vector<4x8x8xf32>
      %44 = tpu.matmul %40, %23, %cst {dimension_numbers = #tpu.dot_dimension_numbers<[2], [2], [1], [1], [0, 0, 0, 1, 1, 1], [0], [0]>} : vector<4x8x32xbf16>, vector<4x8x32xbf16>, vector<4x8x8xf32> -> vector<4x8x8xf32>
      %45 = vector.broadcast %25 : vector<4x1x8xf32> to vector<4x8x8xf32>
      %46 = arith.addf %44, %45 : vector<4x8x8xf32>
      %cst_24 = arith.constant dense<0.000000e+00> : vector<4x8x8xf32>
      %47 = tpu.matmul %43, %27, %cst_24 {dimension_numbers = #tpu.dot_dimension_numbers<[2], [2], [1], [1], [0, 0, 0, 1, 1, 1], [0], [0]>} : vector<4x8x32xbf16>, vector<4x8x32xbf16>, vector<4x8x8xf32> -> vector<4x8x8xf32>
      %48 = vector.broadcast %29 : vector<4x1x8xf32> to vector<4x8x8xf32>
      %49 = arith.addf %47, %48 : vector<4x8x8xf32>
      %cst_25 = arith.constant dense<0.000000e+00> : vector<4x8x8xf32>
      %50 = tpu.matmul %43, %31, %cst_25 {dimension_numbers = #tpu.dot_dimension_numbers<[2], [2], [1], [1], [0, 0, 0, 1, 1, 1], [0], [0]>} : vector<4x8x32xbf16>, vector<4x8x32xbf16>, vector<4x8x8xf32> -> vector<4x8x8xf32>
      %51 = vector.broadcast %33 : vector<4x1x8xf32> to vector<4x8x8xf32>
      %52 = arith.addf %50, %51 : vector<4x8x8xf32>
      %53 = arith.truncf %46 : vector<4x8x8xf32> to vector<4x8x8xbf16>
      %54 = arith.truncf %49 : vector<4x8x8xf32> to vector<4x8x8xbf16>
      %cst_26 = arith.constant dense<0.000000e+00> : vector<4x8x8xf32>
      %55 = tpu.matmul %53, %54, %cst_26 {dimension_numbers = #tpu.dot_dimension_numbers<[2], [2], [1], [1], [0, 0, 0, 1, 1, 1], [0], [0]>} : vector<4x8x8xbf16>, vector<4x8x8xbf16>, vector<4x8x8xf32> -> vector<4x8x8xf32>
      %cst_27 = arith.constant 0.353553385 : f32
      %56 = vector.broadcast %cst_27 : f32 to vector<4x8x8xf32>
      %57 = arith.mulf %55, %56 : vector<4x8x8xf32>
      %cst_28 = arith.constant dense<0xFF800000> : vector<4x8xf32>
      %58 = vector.multi_reduction <maximumf>, %57, %cst_28 [2] : vector<4x8x8xf32> to vector<4x8xf32>
      %59 = vector.shape_cast %58 : vector<4x8xf32> to vector<4x8x1xf32>
      %60 = vector.broadcast %59 : vector<4x8x1xf32> to vector<4x8x8xf32>
      %61 = arith.subf %57, %60 : vector<4x8x8xf32>
      %62 = math.exp %61 : vector<4x8x8xf32>
      %cst_29 = arith.constant dense<0.000000e+00> : vector<4x8xf32>
      %63 = vector.multi_reduction <add>, %62, %cst_29 [2] : vector<4x8x8xf32> to vector<4x8xf32>
      %64 = vector.shape_cast %63 : vector<4x8xf32> to vector<4x8x1xf32>
      %65 = tpu.reciprocal %64 {approx = true} : vector<4x8x1xf32> -> vector<4x8x1xf32>
      %66 = vector.broadcast %65 : vector<4x8x1xf32> to vector<4x8x8xf32>
      %67 = arith.mulf %62, %66 : vector<4x8x8xf32>
      %68 = arith.truncf %67 : vector<4x8x8xf32> to vector<4x8x8xbf16>
      %69 = arith.truncf %52 : vector<4x8x8xf32> to vector<4x8x8xbf16>
      %cst_30 = arith.constant dense<0.000000e+00> : vector<4x8x8xf32>
      %70 = tpu.matmul %68, %69, %cst_30 {dimension_numbers = #tpu.dot_dimension_numbers<[2], [1], [1], [2], [0, 0, 0, 1, 1, 2], [0], [0]>} : vector<4x8x8xbf16>, vector<4x8x8xbf16>, vector<4x8x8xf32> -> vector<4x8x8xf32>
      %71 = arith.truncf %70 : vector<4x8x8xf32> to vector<4x8x8xbf16>
      %cst_31 = arith.constant dense<0.000000e+00> : vector<4x8x32xf32>
      %72 = tpu.matmul %71, %35, %cst_31 {dimension_numbers = #tpu.dot_dimension_numbers<[2], [1], [1], [2], [0, 0, 0, 1, 1, 2], [0], [0]>} : vector<4x8x8xbf16>, vector<4x8x32xbf16>, vector<4x8x32xf32> -> vector<4x8x32xf32>
      %cst_32 = arith.constant dense<0.000000e+00> : vector<8x32xf32>
      %73 = vector.multi_reduction <add>, %72, %cst_32 [0] : vector<4x8x32xf32> to vector<8x32xf32>
      %74 = vector.broadcast %37 : vector<1x32xf32> to vector<8x32xf32>
      %75 = arith.addf %73, %74 : vector<8x32xf32>
      %76 = arith.addf %arg13, %75 : vector<8x32xf32>
      %cst_33 = arith.constant dense<0.000000e+00> : vector<8xf32>
      %77 = vector.multi_reduction <add>, %76, %cst_33 [1] : vector<8x32xf32> to vector<8xf32>
      %78 = vector.shape_cast %77 : vector<8xf32> to vector<8x1xf32>
      %cst_34 = arith.constant 3.200000e+01 : f32
      %79 = vector.broadcast %cst_34 : f32 to vector<8x1xf32>
      %80 = arith.divf %78, %79 : vector<8x1xf32>
      %81 = vector.broadcast %80 : vector<8x1xf32> to vector<8x32xf32>
      %82 = arith.subf %76, %81 : vector<8x32xf32>
      %83 = arith.mulf %82, %82 : vector<8x32xf32>
      %cst_35 = arith.constant dense<0.000000e+00> : vector<8xf32>
      %84 = vector.multi_reduction <add>, %83, %cst_35 [1] : vector<8x32xf32> to vector<8xf32>
      %85 = vector.shape_cast %84 : vector<8xf32> to vector<8x1xf32>
      %cst_36 = arith.constant 3.200000e+01 : f32
      %86 = vector.broadcast %cst_36 : f32 to vector<8x1xf32>
      %87 = arith.divf %85, %86 : vector<8x1xf32>
      %88 = vector.broadcast %80 : vector<8x1xf32> to vector<8x32xf32>
      %89 = arith.subf %76, %88 : vector<8x32xf32>
      %cst_37 = arith.constant 9.99999974E-6 : f32
      %90 = vector.broadcast %cst_37 : f32 to vector<8x1xf32>
      %91 = arith.addf %87, %90 : vector<8x1xf32>
      %92 = math.rsqrt %91 : vector<8x1xf32>
      %93 = vector.broadcast %92 : vector<8x1xf32> to vector<8x32xf32>
      %94 = arith.mulf %89, %93 : vector<8x32xf32>
      %95 = arith.truncf %94 : vector<8x32xf32> to vector<8x32xbf16>
      %96 = vector.extract_strided_slice %11 {offsets = [3, 0, 0, 0], sizes = [1, 4, 8, 32], strides = [1, 1, 1, 1]} : vector<6x4x8x32xbf16> to vector<1x4x8x32xbf16>
      %97 = vector.shape_cast %96 : vector<1x4x8x32xbf16> to vector<4x8x32xbf16>
      %98 = vector.extract_strided_slice %14 {offsets = [3, 0, 0, 0], sizes = [1, 4, 1, 8], strides = [1, 1, 1, 1]} : vector<6x4x1x8xf32> to vector<1x4x1x8xf32>
      %99 = vector.shape_cast %98 : vector<1x4x1x8xf32> to vector<4x1x8xf32>
      %100 = vector.extract_strided_slice %11 {offsets = [4, 0, 0, 0], sizes = [1, 4, 8, 32], strides = [1, 1, 1, 1]} : vector<6x4x8x32xbf16> to vector<1x4x8x32xbf16>
      %101 = vector.shape_cast %100 : vector<1x4x8x32xbf16> to vector<4x8x32xbf16>
      %102 = vector.extract_strided_slice %14 {offsets = [4, 0, 0, 0], sizes = [1, 4, 1, 8], strides = [1, 1, 1, 1]} : vector<6x4x1x8xf32> to vector<1x4x1x8xf32>
      %103 = vector.shape_cast %102 : vector<1x4x1x8xf32> to vector<4x1x8xf32>
      %104 = vector.extract_strided_slice %11 {offsets = [5, 0, 0, 0], sizes = [1, 4, 8, 32], strides = [1, 1, 1, 1]} : vector<6x4x8x32xbf16> to vector<1x4x8x32xbf16>
      %105 = vector.shape_cast %104 : vector<1x4x8x32xbf16> to vector<4x8x32xbf16>
      %106 = vector.extract_strided_slice %14 {offsets = [5, 0, 0, 0], sizes = [1, 4, 1, 8], strides = [1, 1, 1, 1]} : vector<6x4x1x8xf32> to vector<1x4x1x8xf32>
      %107 = vector.shape_cast %106 : vector<1x4x1x8xf32> to vector<4x1x8xf32>
      %108 = vector.extract_strided_slice %17 {offsets = [1, 0, 0, 0], sizes = [1, 4, 8, 32], strides = [1, 1, 1, 1]} : vector<2x4x8x32xbf16> to vector<1x4x8x32xbf16>
      %109 = vector.shape_cast %108 : vector<1x4x8x32xbf16> to vector<4x8x32xbf16>
      %110 = vector.extract_strided_slice %20 {offsets = [1, 0, 0], sizes = [1, 1, 32], strides = [1, 1, 1]} : vector<2x1x32xf32> to vector<1x1x32xf32>
      %111 = vector.shape_cast %110 : vector<1x1x32xf32> to vector<1x32xf32>
      %112 = vector.shape_cast %95 : vector<8x32xbf16> to vector<1x8x32xbf16>
      %113 = vector.shape_cast %112 : vector<1x8x32xbf16> to vector<1x8x32xbf16>
      %114 = vector.broadcast %113 : vector<1x8x32xbf16> to vector<4x8x32xbf16>
      %115 = vector.shape_cast %1 : vector<8x32xbf16> to vector<1x8x32xbf16>
      %116 = vector.shape_cast %115 : vector<1x8x32xbf16> to vector<1x8x32xbf16>
      %117 = vector.broadcast %116 : vector<1x8x32xbf16> to vector<4x8x32xbf16>
      %cst_38 = arith.constant dense<0.000000e+00> : vector<4x8x8xf32>
      %118 = tpu.matmul %114, %97, %cst_38 {dimension_numbers = #tpu.dot_dimension_numbers<[2], [2], [1], [1], [0, 0, 0, 1, 1, 1], [0], [0]>} : vector<4x8x32xbf16>, vector<4x8x32xbf16>, vector<4x8x8xf32> -> vector<4x8x8xf32>
      %119 = vector.broadcast %99 : vector<4x1x8xf32> to vector<4x8x8xf32>
      %120 = arith.addf %118, %119 : vector<4x8x8xf32>
      %cst_39 = arith.constant dense<0.000000e+00> : vector<4x8x8xf32>
      %121 = tpu.matmul %117, %101, %cst_39 {dimension_numbers = #tpu.dot_dimension_numbers<[2], [2], [1], [1], [0, 0, 0, 1, 1, 1], [0], [0]>} : vector<4x8x32xbf16>, vector<4x8x32xbf16>, vector<4x8x8xf32> -> vector<4x8x8xf32>
      %122 = vector.broadcast %103 : vector<4x1x8xf32> to vector<4x8x8xf32>
      %123 = arith.addf %121, %122 : vector<4x8x8xf32>
      %cst_40 = arith.constant dense<0.000000e+00> : vector<4x8x8xf32>
      %124 = tpu.matmul %117, %105, %cst_40 {dimension_numbers = #tpu.dot_dimension_numbers<[2], [2], [1], [1], [0, 0, 0, 1, 1, 1], [0], [0]>} : vector<4x8x32xbf16>, vector<4x8x32xbf16>, vector<4x8x8xf32> -> vector<4x8x8xf32>
      %125 = vector.broadcast %107 : vector<4x1x8xf32> to vector<4x8x8xf32>
      %126 = arith.addf %124, %125 : vector<4x8x8xf32>
      %127 = arith.truncf %120 : vector<4x8x8xf32> to vector<4x8x8xbf16>
      %128 = arith.truncf %123 : vector<4x8x8xf32> to vector<4x8x8xbf16>
      %cst_41 = arith.constant dense<0.000000e+00> : vector<4x8x8xf32>
      %129 = tpu.matmul %127, %128, %cst_41 {dimension_numbers = #tpu.dot_dimension_numbers<[2], [2], [1], [1], [0, 0, 0, 1, 1, 1], [0], [0]>} : vector<4x8x8xbf16>, vector<4x8x8xbf16>, vector<4x8x8xf32> -> vector<4x8x8xf32>
      %cst_42 = arith.constant 0.353553385 : f32
      %130 = vector.broadcast %cst_42 : f32 to vector<4x8x8xf32>
      %131 = arith.mulf %129, %130 : vector<4x8x8xf32>
      %cst_43 = arith.constant dense<0xFF800000> : vector<4x8xf32>
      %132 = vector.multi_reduction <maximumf>, %131, %cst_43 [2] : vector<4x8x8xf32> to vector<4x8xf32>
      %133 = vector.shape_cast %132 : vector<4x8xf32> to vector<4x8x1xf32>
      %134 = vector.broadcast %133 : vector<4x8x1xf32> to vector<4x8x8xf32>
      %135 = arith.subf %131, %134 : vector<4x8x8xf32>
      %136 = math.exp %135 : vector<4x8x8xf32>
      %cst_44 = arith.constant dense<0.000000e+00> : vector<4x8xf32>
      %137 = vector.multi_reduction <add>, %136, %cst_44 [2] : vector<4x8x8xf32> to vector<4x8xf32>
      %138 = vector.shape_cast %137 : vector<4x8xf32> to vector<4x8x1xf32>
      %139 = tpu.reciprocal %138 {approx = true} : vector<4x8x1xf32> -> vector<4x8x1xf32>
      %140 = vector.broadcast %139 : vector<4x8x1xf32> to vector<4x8x8xf32>
      %141 = arith.mulf %136, %140 : vector<4x8x8xf32>
      %142 = arith.truncf %141 : vector<4x8x8xf32> to vector<4x8x8xbf16>
      %143 = arith.truncf %126 : vector<4x8x8xf32> to vector<4x8x8xbf16>
      %cst_45 = arith.constant dense<0.000000e+00> : vector<4x8x8xf32>
      %144 = tpu.matmul %142, %143, %cst_45 {dimension_numbers = #tpu.dot_dimension_numbers<[2], [1], [1], [2], [0, 0, 0, 1, 1, 2], [0], [0]>} : vector<4x8x8xbf16>, vector<4x8x8xbf16>, vector<4x8x8xf32> -> vector<4x8x8xf32>
      %145 = arith.truncf %144 : vector<4x8x8xf32> to vector<4x8x8xbf16>
      %cst_46 = arith.constant dense<0.000000e+00> : vector<4x8x32xf32>
      %146 = tpu.matmul %145, %109, %cst_46 {dimension_numbers = #tpu.dot_dimension_numbers<[2], [1], [1], [2], [0, 0, 0, 1, 1, 2], [0], [0]>} : vector<4x8x8xbf16>, vector<4x8x32xbf16>, vector<4x8x32xf32> -> vector<4x8x32xf32>
      %cst_47 = arith.constant dense<0.000000e+00> : vector<8x32xf32>
      %147 = vector.multi_reduction <add>, %146, %cst_47 [0] : vector<4x8x32xf32> to vector<8x32xf32>
      %148 = vector.broadcast %111 : vector<1x32xf32> to vector<8x32xf32>
      %149 = arith.addf %147, %148 : vector<8x32xf32>
      %150 = arith.addf %94, %149 : vector<8x32xf32>
      %cst_48 = arith.constant dense<0.000000e+00> : vector<8xf32>
      %151 = vector.multi_reduction <add>, %150, %cst_48 [1] : vector<8x32xf32> to vector<8xf32>
      %152 = vector.shape_cast %151 : vector<8xf32> to vector<8x1xf32>
      %cst_49 = arith.constant 3.200000e+01 : f32
      %153 = vector.broadcast %cst_49 : f32 to vector<8x1xf32>
      %154 = arith.divf %152, %153 : vector<8x1xf32>
      %155 = vector.broadcast %154 : vector<8x1xf32> to vector<8x32xf32>
      %156 = arith.subf %150, %155 : vector<8x32xf32>
      %157 = arith.mulf %156, %156 : vector<8x32xf32>
      %cst_50 = arith.constant dense<0.000000e+00> : vector<8xf32>
      %158 = vector.multi_reduction <add>, %157, %cst_50 [1] : vector<8x32xf32> to vector<8xf32>
      %159 = vector.shape_cast %158 : vector<8xf32> to vector<8x1xf32>
      %cst_51 = arith.constant 3.200000e+01 : f32
      %160 = vector.broadcast %cst_51 : f32 to vector<8x1xf32>
      %161 = arith.divf %159, %160 : vector<8x1xf32>
      %162 = vector.broadcast %154 : vector<8x1xf32> to vector<8x32xf32>
      %163 = arith.subf %150, %162 : vector<8x32xf32>
      %cst_52 = arith.constant 9.99999974E-6 : f32
      %164 = vector.broadcast %cst_52 : f32 to vector<8x1xf32>
      %165 = arith.addf %161, %164 : vector<8x1xf32>
      %166 = math.rsqrt %165 : vector<8x1xf32>
      %167 = vector.broadcast %166 : vector<8x1xf32> to vector<8x32xf32>
      %168 = arith.mulf %163, %167 : vector<8x32xf32>
      %169 = arith.truncf %168 : vector<8x32xf32> to vector<8x32xbf16>
      %170 = arith.index_cast %arg12 : i32 to index
      %c0_53 = arith.constant 0 : index
      %c0_54 = arith.constant 0 : index
      %171 = vector.load %arg7[%170, %c0_53, %c0_54] : memref<2x32x64xbf16, #tpu.memory_space<vmem>>, vector<1x32x64xbf16>
      %172 = vector.shape_cast %171 : vector<1x32x64xbf16> to vector<32x64xbf16>
      %cst_55 = arith.constant dense<0.000000e+00> : vector<8x64xf32>
      %173 = tpu.matmul %169, %172, %cst_55 {dimension_numbers = #tpu.dot_dimension_numbers<[1], [0], [0], [1], [0, 0, 1, 1], [], []>} : vector<8x32xbf16>, vector<32x64xbf16>, vector<8x64xf32> -> vector<8x64xf32>
      %174 = arith.index_cast %arg12 : i32 to index
      %c0_56 = arith.constant 0 : index
      %c0_57 = arith.constant 0 : index
      %175 = vector.load %arg8[%174, %c0_56, %c0_57] : memref<2x1x64xf32, #tpu.memory_space<vmem>>, vector<1x1x64xf32>
      %176 = vector.shape_cast %175 : vector<1x1x64xf32> to vector<1x64xf32>
      %177 = vector.broadcast %176 : vector<1x64xf32> to vector<8x64xf32>
      %178 = arith.addf %173, %177 : vector<8x64xf32>
      %cst_58 = arith.constant 0.000000e+00 : f32
      %179 = vector.broadcast %cst_58 : f32 to vector<8x64xf32>
      %180 = arith.maximumf %178, %179 : vector<8x64xf32>
      %181 = arith.truncf %180 : vector<8x64xf32> to vector<8x64xbf16>
      %182 = arith.index_cast %arg12 : i32 to index
      %c0_59 = arith.constant 0 : index
      %c0_60 = arith.constant 0 : index
      %183 = vector.load %arg9[%182, %c0_59, %c0_60] : memref<2x64x32xbf16, #tpu.memory_space<vmem>>, vector<1x64x32xbf16>
      %184 = vector.shape_cast %183 : vector<1x64x32xbf16> to vector<64x32xbf16>
      %cst_61 = arith.constant dense<0.000000e+00> : vector<8x32xf32>
      %185 = tpu.matmul %181, %184, %cst_61 {dimension_numbers = #tpu.dot_dimension_numbers<[1], [0], [0], [1], [0, 0, 1, 1], [], []>} : vector<8x64xbf16>, vector<64x32xbf16>, vector<8x32xf32> -> vector<8x32xf32>
      %186 = arith.index_cast %arg12 : i32 to index
      %c0_62 = arith.constant 0 : index
      %c0_63 = arith.constant 0 : index
      %187 = vector.load %arg10[%186, %c0_62, %c0_63] : memref<2x1x32xf32, #tpu.memory_space<vmem>>, vector<1x1x32xf32>
      %188 = vector.shape_cast %187 : vector<1x1x32xf32> to vector<1x32xf32>
      %189 = vector.broadcast %188 : vector<1x32xf32> to vector<8x32xf32>
      %190 = arith.addf %185, %189 : vector<8x32xf32>
      %191 = arith.addf %168, %190 : vector<8x32xf32>
      %cst_64 = arith.constant dense<0.000000e+00> : vector<8xf32>
      %192 = vector.multi_reduction <add>, %191, %cst_64 [1] : vector<8x32xf32> to vector<8xf32>
      %193 = vector.shape_cast %192 : vector<8xf32> to vector<8x1xf32>
      %cst_65 = arith.constant 3.200000e+01 : f32
      %194 = vector.broadcast %cst_65 : f32 to vector<8x1xf32>
      %195 = arith.divf %193, %194 : vector<8x1xf32>
      %196 = vector.broadcast %195 : vector<8x1xf32> to vector<8x32xf32>
      %197 = arith.subf %191, %196 : vector<8x32xf32>
      %198 = arith.mulf %197, %197 : vector<8x32xf32>
      %cst_66 = arith.constant dense<0.000000e+00> : vector<8xf32>
      %199 = vector.multi_reduction <add>, %198, %cst_66 [1] : vector<8x32xf32> to vector<8xf32>
      %200 = vector.shape_cast %199 : vector<8xf32> to vector<8x1xf32>
      %cst_67 = arith.constant 3.200000e+01 : f32
      %201 = vector.broadcast %cst_67 : f32 to vector<8x1xf32>
      %202 = arith.divf %200, %201 : vector<8x1xf32>
      %203 = vector.broadcast %195 : vector<8x1xf32> to vector<8x32xf32>
      %204 = arith.subf %191, %203 : vector<8x32xf32>
      %cst_68 = arith.constant 9.99999974E-6 : f32
      %205 = vector.broadcast %cst_68 : f32 to vector<8x1xf32>
      %206 = arith.addf %202, %205 : vector<8x1xf32>
      %207 = math.rsqrt %206 : vector<8x1xf32>
      %208 = vector.broadcast %207 : vector<8x1xf32> to vector<8x32xf32>
      %209 = arith.mulf %204, %208 : vector<8x32xf32>
      scf.yield %209 : vector<8x32xf32>
    }
    %c2_i32_5 = arith.constant 2 : i32
    %c0_6 = arith.constant 0 : index
    %c0_7 = arith.constant 0 : index
    %c0_8 = arith.constant 0 : index
    %6 = vector.load %arg11[%c0_6, %c0_7, %c0_8] : memref<1x8x32xf32, #tpu.memory_space<vmem>>, vector<1x8x32xf32>
    %7 = vector.shape_cast %6 : vector<1x8x32xf32> to vector<8x32xf32>
    %8 = vector.shape_cast %5 : vector<8x32xf32> to vector<1x8x32xf32>
    tpu.vector_store %arg11[%c0_6, %c0_7, %c0_8], %8 {strides = array<i32>} : memref<1x8x32xf32, #tpu.memory_space<vmem>>, vector<1x8x32xf32>,
    return
  }
  func.func @transform_0(%arg0: i32) -> (i32, i32, i32) {
    %c0_i32 = arith.constant 0 : i32
    %c0_i32_0 = arith.constant 0 : i32
    %c0_i32_1 = arith.constant 0 : i32
    return %arg0, %c0_i32, %c0_i32_0 : i32, i32, i32
  }
  func.func @transform_1(%arg0: i32) -> (i32, i32, i32) {
    %c0_i32 = arith.constant 0 : i32
    %c0_i32_0 = arith.constant 0 : i32
    %c0_i32_1 = arith.constant 0 : i32
    return %arg0, %c0_i32, %c0_i32_0 : i32, i32, i32
  }
  func.func @transform_2(%arg0: i32) -> (i32, i32, i32, i32, i32) {
    %c0_i32 = arith.constant 0 : i32
    %c0_i32_0 = arith.constant 0 : i32
    %c0_i32_1 = arith.constant 0 : i32
    %c0_i32_2 = arith.constant 0 : i32
    %c0_i32_3 = arith.constant 0 : i32
    %c0_i32_4 = arith.constant 0 : i32
    return %c0_i32, %c0_i32_0, %c0_i32_1, %c0_i32_2, %c0_i32_3 : i32, i32, i32, i32, i32
  }
  func.func @transform_3(%arg0: i32) -> (i32, i32, i32, i32, i32) {
    %c0_i32 = arith.constant 0 : i32
    %c0_i32_0 = arith.constant 0 : i32
    %c0_i32_1 = arith.constant 0 : i32
    %c0_i32_2 = arith.constant 0 : i32
    %c0_i32_3 = arith.constant 0 : i32
    %c0_i32_4 = arith.constant 0 : i32
    return %c0_i32, %c0_i32_0, %c0_i32_1, %c0_i32_2, %c0_i32_3 : i32, i32, i32, i32, i32
  }
  func.func @transform_4(%arg0: i32) -> (i32, i32, i32, i32, i32) {
    %c0_i32 = arith.constant 0 : i32
    %c0_i32_0 = arith.constant 0 : i32
    %c0_i32_1 = arith.constant 0 : i32
    %c0_i32_2 = arith.constant 0 : i32
    %c0_i32_3 = arith.constant 0 : i32
    %c0_i32_4 = arith.constant 0 : i32
    return %c0_i32, %c0_i32_0, %c0_i32_1, %c0_i32_2, %c0_i32_3 : i32, i32, i32, i32, i32
  }
  func.func @transform_5(%arg0: i32) -> (i32, i32, i32, i32) {
    %c0_i32 = arith.constant 0 : i32
    %c0_i32_0 = arith.constant 0 : i32
    %c0_i32_1 = arith.constant 0 : i32
    %c0_i32_2 = arith.constant 0 : i32
    %c0_i32_3 = arith.constant 0 : i32
    return %c0_i32, %c0_i32_0, %c0_i32_1, %c0_i32_2 : i32, i32, i32, i32
  }
  func.func @transform_6(%arg0: i32) -> (i32, i32, i32) {
    %c0_i32 = arith.constant 0 : i32
    %c0_i32_0 = arith.constant 0 : i32
    %c0_i32_1 = arith.constant 0 : i32
    %c0_i32_2 = arith.constant 0 : i32
    return %c0_i32, %c0_i32_0, %c0_i32_1 : i32, i32, i32
  }
  func.func @transform_7(%arg0: i32) -> (i32, i32, i32) {
    %c0_i32 = arith.constant 0 : i32
    %c0_i32_0 = arith.constant 0 : i32
    %c0_i32_1 = arith.constant 0 : i32
    %c0_i32_2 = arith.constant 0 : i32
    return %c0_i32, %c0_i32_0, %c0_i32_1 : i32, i32, i32
  }
  func.func @transform_8(%arg0: i32) -> (i32, i32, i32) {
    %c0_i32 = arith.constant 0 : i32
    %c0_i32_0 = arith.constant 0 : i32
    %c0_i32_1 = arith.constant 0 : i32
    %c0_i32_2 = arith.constant 0 : i32
    return %c0_i32, %c0_i32_0, %c0_i32_1 : i32, i32, i32
  }
  func.func @transform_9(%arg0: i32) -> (i32, i32, i32) {
    %c0_i32 = arith.constant 0 : i32
    %c0_i32_0 = arith.constant 0 : i32
    %c0_i32_1 = arith.constant 0 : i32
    %c0_i32_2 = arith.constant 0 : i32
    return %c0_i32, %c0_i32_0, %c0_i32_1 : i32, i32, i32
  }
  func.func @transform_10(%arg0: i32) -> (i32, i32, i32) {
    %c0_i32 = arith.constant 0 : i32
    %c0_i32_0 = arith.constant 0 : i32
    %c0_i32_1 = arith.constant 0 : i32
    return %arg0, %c0_i32, %c0_i32_0 : i32, i32, i32
  }
}

</mosaic_0001>

<bundles_post_ra>
// kernel: tpu_custom_call.1
= control target key start
LH: loop header
LB: loop body
LE: loop exit
PB: predicated region body
PF: predicated region fallthrough
CT: control target
= control target key end

     0   :  { %s3016_s0 = inlined_call_operand.hbm [shape: f32[2,8,32], index: 0, kind: input, shape index: {}]   ;;  %s3017_s1 = inlined_call_operand.hbm [shape: bf16[2,8,32], index: 1, kind: input, shape index: {}]   ;;  %s3018_s2 = inlined_call_operand.hbm [shape: bf16[2,6,4,8,32], index: 2, kind: input, shape index: {}]   ;;  %s3019_s3 = inlined_call_operand.hbm [shape: f32[2,6,4,1,8], index: 3, kind: input, shape index: {}]   ;;  %s3020_s4 = inlined_call_operand.vmem [shape: bf16[2,2,4,8,32], index: 4, kind: input, shape index: {}]   ;;  %s3021_s5 = inlined_call_operand.hbm [shape: f32[2,2,1,32], index: 5, kind: input, shape index: {}]   ;;  %s3022_s6 = inlined_call_operand.vmem [shape: bf16[2,32,64], index: 6, kind: input, shape index: {}]   ;;  %s3023_s7 = inlined_call_operand.vmem [shape: f32[2,1,64], index: 7, kind: input, shape index: {}]   ;;  %s3024_s8 = inlined_call_operand.vmem [shape: bf16[2,64,32], index: 8, kind: input, shape index: {}]   ;;  %s3025_s9 = inlined_call_operand.vmem [shape: f32[2,1,32], index: 9, kind: input, shape index: {}]   ;;  %s3026_s10 = inlined_call_operand.hbm [shape: f32[2,8,32], index: 10, kind: output, shape index: {}]  }
   0x1   :  { %3033 = sst [smem:[#allocation22_spill]] %s3018_s2 }
   0x2   :  { %3034 = sst [smem:[#allocation23_spill]] %s3019_s3 }
   0x3   :  { %3035 = sst [smem:[#allocation24_spill]] %s3021_s5 }
   0x4   :  { %3036 = sst [smem:[#allocation25_spill]] %s3026_s10 }
   0x5   :  { %15 = vsyncpa [#allocation3], 0 }
   0x6   :  { %17 = vsyncpa [#allocation3 + $0x1], 0 }
   0x7   :  { %18 = vsyncpa [#allocation6], 0 }
   0x8   :  { %20 = vsyncpa [#allocation6 + $0x1], 0 }
   0x9   :  { %21 = vsyncpa [#allocation9], 0 }
   0xa   :  { %22 = vsyncpa [#allocation4], 0 }
   0xb   :  { %24 = vsyncpa [#allocation4 + $0x1], 0  ;;  %s2554_s13 = smov 0   ;;  %s2556_s14 = smov 0  }
   0xc   :  { %s2558_s15 = smov 0   ;;  %s2560_s16 = smov 0  }
   0xd LB: > { %3037 = sst [smem:[#allocation17_spill]] %s2469_s13  ;;  %s2578_s20 = sadd.s32 4294967295, %s2481_s16   ;;  %s2481_s16 = sphi %s2560_s16, %s3058_s16   ;;  %s2477_s15 = sphi %s2558_s15, %s3060_s15   ;;  %s2473_s14 = sphi %s2556_s14, %s3062_s14   ;;  %s2469_s13 = sphi %s2554_s13, %s3061_s13  }
   0xe   : > { %3038 = sst [smem:[#allocation18_spill]] %s2477_s15  ;;  %p1963_p0 = scmp.ge.s32.totalorder %s2481_s16, 1 }
   0xf   : > { %s3039_s2 = sld [smem:[#allocation22_spill]]  ;;  %p51_p1 = scmp.eq.s32.totalorder %s2578_s20, 0 }
  0x10   : > { %p281_p2 = scmp.lt.s32.totalorder %s2481_s16, 3  ;;  %s2491_s22 = smov [#allocation7]  }
  0x11   : > { %s294_s23 = sshll.u32 %s2491_s22, 4  ;;  %s3041_s3 = sld [smem:[#allocation23_spill]]  ;;  %s295_s23 = int_to_ptr.vmem [resolvable:$true] %s294_s23 }
  0x12   : > { %p2583_p3 = pnand %p1963_p0, %p281_p2  ;;  %s2492_s28 = smov [#allocation8]  }
  0x13   : > { %s308_s29 = sshll.u32 %s2492_s28, 4  ;;  %s2493_s30 = smov 64   ;;  %s309_s29 = int_to_ptr.vmem [resolvable:$true] %s308_s29 }
  0x14   : > { %p2092_p4 = pneg %p2583_p3  ;;  %s2494_s11 = smov 4  }
  0x15   : > { %s292_s19 = sshll.u32 %s3039_s2, 4  ;;  %s2495_s12 = smov 16   ;;  %s293_s19 = int_to_ptr.hbm [resolvable:$true] %s292_s19 }
  0x16   : > { %p2595_p6 = pnand %p2092_p4, %p51_p1  ;;  %s2496_s17 = smov 1  }
  0x17   : > { %s306_s26 = sshll.u32 %s3041_s3, 4  ;;  %s3043_s5 = sld [smem:[#allocation24_spill]]  ;;  %s307_s26 = int_to_ptr.hbm [resolvable:$true] %s306_s26 }
  0x18   : > { %2095 = dma.hbm_to_vmem [thread:$0]  (!%p2595_p6), %s293_s19, 3072, %s295_s23, [#allocation6], %s2493_s30, %s2493_s30, %s2494_s11  }
  0x19   : > { %2098 = dma.hbm_to_vmem [thread:$0]  (!%p2595_p6), %s307_s26, 768, %s309_s29, [#allocation9], %s2495_s12, %s2495_s12, %s2496_s17  }
  0x1a   : > { %s2497_s25 = smov [#allocation10]   ;;  %s1962_s19 = sadd.s32 4294967294, %s2481_s16  }
  0x1b   : > { %s325_s28 = sshll.u32 %s2497_s25, 4  ;;  %s2610_s23 = sadd.s32 1, %s2481_s16   ;;  %s326_s28 = int_to_ptr.vmem [resolvable:$true] %s325_s28 }
  0x1c   : > { %3044 = sst [smem:[#allocation19_spill]] %s2610_s23  ;;  %s37_s30 = sadd.s32 1, %s2477_s15 }
  0x1d   : > { %s323_s24 = sshll.u32 %s3043_s5, 4  ;;  %s34_s26 = ssub.s32 %s2481_s16, %s2610_s23  ;;  %s324_s24 = int_to_ptr.hbm [resolvable:$true] %s323_s24 }
  0x1e   : > { %2101 = dma.hbm_to_vmem [thread:$0]  (!%p2595_p6), %s324_s24, 64, %s326_s28, [#allocation9], %s2495_s12, %s2495_s12, %s2496_s17  }
  0x1f   : > { %p44_p7 = scmp.ne.s32.totalorder %s2477_s15, %s2473_s14  ;;  %p35_p8 = scmp.eq.s32.totalorder %s34_s26, 0 }
  0x20   : > { %p45_p9 = scmp.eq.s32.totalorder %s2481_s16, 0  ;;  %p50_p10 = scmp.ne.s32.totalorder %s2473_s14, %s2469_s13 }
  0x21   : > { %p268_p11 = scmp.eq.s32.totalorder %s2578_s20, 1  ;;  %p274_p2 = scmp.eq.s32.totalorder %s1962_s19, 1 }
  0x22   : > { %s2622_s29 = scalar_select %p35_p8, %s2477_s15, %s37_s30  }
  0x23   : > { %p2624_p12 = por %p45_p9, %p44_p7  ;;  %p2630_p13 = por %p51_p1, %p50_p10 }
  0x24   : > { %3045 = sst [smem:[#allocation20_spill]] %s2622_s29  ;;  %p2634_p0 = por %p268_p11, %p44_p7 }
  0x25   : > { %p2116_p4 = scmp.lt.s32.totalorder %s2481_s16, 2  ;;  %s2640_s17 = sand.u32 1, %s2477_s15  }
  0x26   : > { %p2642_p6 = por %p274_p2, %p50_p10  ;;  %s1968_s22 = sshll.u32 %s2640_s17, 3 }
  0x27   : > { %s1969_s24 = sshll.u32 %s2481_s16, 3  ;;  %s355_s2 = scalar_lea.vmem [#allocation2], %s1968_s22 }
  0x28   : > { %s3049_s18 = scalar_select %p2642_p6, 1, 0 }
  0x29   : > { %s359_s30 = scalar_lea.hbm %s3016_s0, %s1969_s24  ;;  %s363_s3 = sshll.u32 %s355_s2, 4  ;;  %s364_s3 = int_to_ptr.vmem [resolvable:$true] %s363_s3 }
  0x2a   : > { %3050 = sst [smem:[#allocation21_spill]] %s3049_s18  ;;  %s361_s26 = sshll.u32 %s359_s30, 4  ;;  %s362_s26 = int_to_ptr.hbm [resolvable:$true] %s361_s26 }
  0x2b   : > { %p2653_p7 = pnand %p2116_p4, %p2624_p12  ;;  %s370_s5 = sand.u32 1, %s2481_s16  }
  0x2c   : > { %s1970_s29 = sshll.u32 %s2640_s17, 2  ;;  %s352_s15 = scalar_lea.sflag [#allocation3], %s2640_s17 }
  0x2d   : > { %s2335_s23 = sshra.s32 %s362_s26, 4  ;;  %p2339_p9 = pneg %p2653_p7  ;;  %s2336_s23 = int_to_ptr.hbm [resolvable:$true] %s2335_s23 }
  0x2e   : > { %s2337_s18 = scalar_lea.hbm %s2336_s23, 8  ;;  %s2342_s22 = scalar_lea.hbm %s3016_s0, 16 }
  0x2f   : > { %p2338_p8 = scmp.ne.s32.totalorder %s2336_s23, %s2337_s18  ;;  %p2343_p12 = scmp.lt.s32.totalorder %s2336_s23, %s3016_s0 }
  0x30   : > { %p2344_p2 = scmp.lt.s32.totalorder %s2342_s22, %s2337_s18 }
  0x31   : > { %p2340_p10 = pnand %p2339_p9, %p2338_p8 }
  0x32   : > { %p2345_p4 = por %p2344_p2, %p2343_p12 }
  0x33   : > { %p2341_p11 = pneg %p2340_p10 }
  0x35   : > { %p2346_p5 = pnand %p2345_p4, %p2341_p11 }
  0x37   : > { %2349 = shalt.err (!%p2346_p5)
}
  0x38   : > { %2105 = dma.hbm_to_vmem [thread:$0]  (!%p2653_p7), %s362_s26, 128, %s364_s3, %s352_s15  }
  0x39   : > { %s1971_s17 = sshll.u32 %s2481_s16, 2  ;;  %s374_s28 = scalar_lea.vmem [#allocation5], %s1970_s29 }
  0x3a   : > { %s382_s30 = sshll.u32 %s374_s28, 4  ;;  %s378_s2 = scalar_lea.hbm %s3017_s1, %s1971_s17  ;;  %s383_s30 = int_to_ptr.vmem [resolvable:$true] %s382_s30 }
  0x3b   : > { %s380_s11 = sshll.u32 %s378_s2, 4  ;;  %s371_s23 = scalar_lea.sflag [#allocation6], %s370_s5  ;;  %s381_s11 = int_to_ptr.hbm [resolvable:$true] %s380_s11 }
  0x3c   : > { %s2365_s18 = sshra.s32 %s381_s11, 4  ;;  %s2372_s29 = scalar_lea.hbm %s3017_s1, 8  ;;  %s2366_s18 = int_to_ptr.hbm [resolvable:$true] %s2365_s18 }
  0x3d   : > { %s2367_s22 = scalar_lea.hbm %s2366_s18, 4  ;;  %p2373_p11 = scmp.lt.s32.totalorder %s2366_s18, %s3017_s1 }
  0x3e   : > { %p2368_p5 = scmp.ne.s32.totalorder %s2366_s18, %s2367_s22  ;;  %p2374_p12 = scmp.lt.s32.totalorder %s2372_s29, %s2367_s22 }
  0x40   : > { %p2370_p8 = pnand %p2368_p5, %p2339_p9  ;;  %p2375_p2 = por %p2374_p12, %p2373_p11 }
  0x42   : > { %p2371_p10 = pneg %p2370_p8 }
  0x44   : > { %p2376_p4 = pnand %p2375_p2, %p2371_p10 }
  0x46   : > { %2379 = shalt.err (!%p2376_p4)
}
  0x47   : > { %2108 = dma.hbm_to_vmem [thread:$0]  (!%p2653_p7), %s381_s11, 64, %s383_s30, %s371_s23  }
  0x48   : > { %391 = sbr.rel (%p2583_p3) target bundleno = 2821 (0xb05), region = 60  ;;  %s2691_s5 = sand.u32 (!%p2583_p3), 1, %s2473_s14  }
  0x49   : > { %s1973_s10 = sshll.u32 (!%p2583_p3), %s2691_s5, 3  ;;  %s394_s13 = scalar_lea.sflag (!%p2583_p3), [#allocation3], %s2691_s5 }
  0x4a   : > { %s397_s25 = scalar_lea.vmem (!%p2583_p3), [#allocation2], %s1973_s10 }
  0x4d   : > { %2448 = dma.done.wait (%p2630_p13), %s394_s13, 128  }
  0x4e   : > { %2450 = vsyncadd (%p2630_p13), %s394_s13, 4294967168  ;;  %s403_s19 = sand.u32 1, %s2578_s20   ;;  %s1974_s21 = sshll.u32 %s2691_s5, 2 }
  0x4f   : > { %s404_s17 = scalar_lea.sflag [#allocation6], %s403_s19  ;;  %s407_s28 = scalar_lea.vmem [#allocation5], %s1974_s21 }
  0x50   : > { %2452 = dma.done.wait (%p2630_p13), %s404_s17, 64  }
  0x51   : > { %2454 = vsyncadd (%p2630_p13), %s404_s17, 4294967232 }
  0x52   : > { %2456 = dma.done.wait (%p51_p1), [#allocation6], 3072  }
  0x53   : > { %2458 = vsyncadd (%p51_p1), [#allocation6], 4294964224 }
  0x54   : > { %2460 = dma.done.wait (%p51_p1), [#allocation9], 832  }
  0x55   : > { %2462 = vsyncadd (%p51_p1), [#allocation9], 4294966464  ;;  %v2713_v0 = vld [vmem:[%s407_s28] sm:$0xf]  ;;  %v467_v1 = vld [vmem:[%s397_s25] sm:$0xff]   ;;  %s2715_s30 = scalar_lea.vmem [#allocation11], %s1973_s10 }
  0x56   : > { %s2719_s27 = smov 0  }
  0x57 LB: >> { %s2064_s2 = smul.u32 96, %s2489_s27  ;;  %vm555_vm0 = vcmask 261120   ;;  %v542_v18 = vpack.c.bf16 %v2485_v1, %v2485_v1  ;;  %vm783_vm1 = vcmask 64512   ;;  %vm919_vm2 = vcmask 1043456   ;;  %s2065_s22 = sshll.u32 %s2489_s27, 5  ;;  %s2489_s27 = sphi %s2719_s27, %s473_s27   ;;  %v2485_v1 = vphi %v467_v1, %v3052_v1  }
  0x58   : >> { %s475_s11 = smul.u32 24, %s2489_s27  ;;  %s2813_s29 = scalar_lea.vmem %s3020_s4, %s2065_s22  ;;  %vm1761_vm10 = vcmask 523264  }
  0x59   : >> { %s2729_s23 = scalar_lea.vmem [#allocation7], %s2064_s2  ;;  %s1982_s26 = sshll.u32 %s2489_s27, 1 }
  0x5a   : >> { %v478_v2 = vld [vmem:[%s2729_s23] sm:$0xf]  ;;  %v479_v3 = vld [vmem:[%s2729_s23 + $0x4] sm:$0xf]  ;;  %v480_v4 = vld [vmem:[%s2729_s23 + $0x8] sm:$0xf]  ;;  %s1687_s25 = scalar_lea.vmem %s3023_s7, %s2489_s27  ;;  %s1732_s3 = scalar_lea.vmem %s3025_s9, %s2489_s27 }
  0x5b   : >> { %v560_v5 = vsel %vm555_vm0, %v478_v2, 0  ;;  %v576_v6 = vsel %vm555_vm0, %v479_v3, 0  ;;  %v592_v7 = vsel %vm555_vm0, %v480_v4, 0  ;;  %v481_v8 = vld [vmem:[%s2729_s23 + $0xc] sm:$0xf]  ;;  %s2747_s18 = scalar_lea.vmem [#allocation8], %s475_s11 }
  0x5c   : >> { %569 = vmatpush.bf16.xpose.msra.mxu0 %v560_v5  ;;  %585 = vmatpush.bf16.xpose.msra.mxu1 %v576_v6  ;;  %v608_v9 = vsel %vm555_vm0, %v481_v8, 0  ;;  %v482_v10 = vld [vmem:[%s2729_s23 + $0x10] sm:$0xf]  ;;  %v483_v11 = vld [vmem:[%s2729_s23 + $0x14] sm:$0xf]  ;;  %s2828_s24 = scalar_lea.vmem [#allocation10], %s1982_s26 }
  0x5d   : >> { %601 = vmatpush.bf16.xpose.msra.mxu2 %v592_v7  ;;  %617 = vmatpush.bf16.xpose.msra.mxu3 %v608_v9  ;;  %v636_v12 = vsel %vm555_vm0, %v482_v10, 0  ;;  %v652_v13 = vsel %vm555_vm0, %v483_v11, 0  ;;  %v484_v14 = vld [vmem:[%s2729_s23 + $0x18] sm:$0xf]  ;;  %v485_v15 = vld [vmem:[%s2729_s23 + $0x1c] sm:$0xf] }
  0x5e   : >> { %v668_v16 = vsel %vm555_vm0, %v484_v14, 0  ;;  %v684_v17 = vsel %vm555_vm0, %v485_v15, 0  ;;  %v488_v19 = vld [vmem:[%s2729_s23 + $0x28] sm:$0xf]  ;;  %v486_v21 = vld [vmem:[%s2729_s23 + $0x20] sm:$0xf] }
  0x5f   : >> { %v744_v20 = vsel %vm555_vm0, %v488_v19, 0  ;;  %v487_v22 = vld [vmem:[%s2729_s23 + $0x24] sm:$0xf]  ;;  %v712_v23 = vsel %vm555_vm0, %v486_v21, 0  ;;  %v489_v25 = vld [vmem:[%s2729_s23 + $0x2c] sm:$0xf] }
  0x60   : >> { %v728_v24 = vsel %vm555_vm0, %v487_v22, 0  ;;  %v760_v26 = vsel %vm555_vm0, %v489_v25, 0  ;;  %v2181_v33 = vld [vmem:[%s2747_s18 + $0x4] ss:$0 sm:$0xff]  ;;  %v2182_v34 = vld [vmem:[%s2747_s18 + $0x5] ss:$0 sm:$0xff] }
  0x61   : >> { %v2178_v41 = vld [vmem:[%s2747_s18 + $0x1] ss:$0 sm:$0xff]  ;;  %v2177_v44 = vld [vmem:[%s2747_s18] ss:$0 sm:$0xff]  ;;  %v2183_v45 = vld [vmem:[%s2747_s18 + $0x6] ss:$0 sm:$0xff] }
  0x62   : >> { %v2184_v46 = vld [vmem:[%s2747_s18 + $0x7] ss:$0 sm:$0xff]  ;;  %v2179_v58 = vld [vmem:[%s2747_s18 + $0x2] ss:$0 sm:$0xff]  ;;  %v2180_v59 = vld [vmem:[%s2747_s18 + $0x3] ss:$0 sm:$0xff] }
  0x63   : >> { %1983 = vmatmul.msk.bf16.vlgmr.msra.gmra.mxu0 %vm555_vm0, %v542_v18  ;;  %1984 = vmatmul.msk.bf16.vlgmr.msra.gmra.mxu1 %vm555_vm0, %v542_v18  ;;  %v2185_v9 = vld [vmem:[%s2747_s18 + $0x8] ss:$0 sm:$0xff]  ;;  %v2186_v10 = vld [vmem:[%s2747_s18 + $0x9] ss:$0 sm:$0xff]  ;;  %v2187_v15 = vld [vmem:[%s2747_s18 + $0xa] ss:$0 sm:$0xff] }
  0x64   : >> { %645 = vmatpush.bf16.xpose.msrb.mxu0 %v636_v12  ;;  %661 = vmatpush.bf16.xpose.msrb.mxu1 %v652_v13  ;;  %v2188_v25 = vld [vmem:[%s2747_s18 + $0xb] ss:$0 sm:$0xff]  ;;  %s2066_s19 = sshll.u32 %s2489_s27, 4  ;;  %s473_s27 = sadd.s32 1, %s2489_s27  }
  0x65   : >> { %677 = vmatpush.bf16.xpose.msrb.mxu2 %v668_v16  ;;  %693 = vmatpush.bf16.xpose.msrb.mxu3 %v684_v17  ;;  %s1682_s28 = scalar_lea.vmem %s3022_s6, %s2066_s19  ;;  %p470_p1 = scmp.ge.s32.totalorder %s473_s27, 2  }
  0x66   : >> { %1985 = vmatmul.msk.bf16.vlgmr.msra.gmra.mxu2 %vm555_vm0, %v542_v18  ;;  %1986 = vmatmul.msk.bf16.vlgmr.msra.gmra.mxu3 %vm555_vm0, %v542_v18  ;;  %s2061_s26 = sshll.u32 (%p470_p1), %s2578_s20, 3  ;;  %s3053_s13 = sld [smem:[#allocation25_spill]] (%p470_p1) }
  0x67   : > { %s1816_s21 = sshll.u32 (%p470_p1), %s2715_s30, 4  ;;  %s1817_s21 = int_to_ptr.vmem [resolvable:$true] %s1816_s21 }
  0x6c   : >> { %721 = vmatpush.bf16.xpose.msra.mxu0 %v712_v23  ;;  %737 = vmatpush.bf16.xpose.msra.mxu1 %v728_v24  ;;  %s1814_s19 = scalar_lea.hbm (%p470_p1), %s3053_s13, %s2061_s26 }
  0x6d   : >> { %753 = vmatpush.bf16.xpose.msra.mxu2 %v744_v20  ;;  %769 = vmatpush.bf16.xpose.msra.mxu3 %v760_v26  ;;  %s1818_s17 = sshll.u32 (%p470_p1), %s1814_s19, 4  ;;  %s1819_s17 = int_to_ptr.hbm [resolvable:$true] %s1818_s17 }
  0x6e   : > { %s2409_s2 = sshra.s32 (%p470_p1), %s1819_s17, 4  ;;  %s2410_s2 = int_to_ptr.hbm [resolvable:$true] %s2409_s2 }
  0x6f   : > { %s2411_s27 = scalar_lea.hbm (%p470_p1), %s2410_s2, 8 }
  0x70   : > { %p2412_p3 = scmp.ne.s32.totalorder (%p470_p1), %s2410_s2, %s2411_s27 }
  0x72   : > { %p2413_p13 = pnand (%p470_p1), %p2412_p3, %p2634_p0 }
  0x73   : >> { %1987 = vmatmul.msk.bf16.vlgmr.msrb.gmra.mxu0 %vm555_vm0, %v542_v18  ;;  %1988 = vmatmul.msk.bf16.vlgmr.msrb.gmra.mxu1 %vm555_vm0, %v542_v18 }
  0x74   : > { %p2414_p7 = pneg (%p470_p1), %p2413_p13 }
  0x76   : >> { %1989 = vmatmul.msk.bf16.vlgmr.msrb.gmra.mxu2 %vm555_vm0, %v542_v18  ;;  %1990 = vmatmul.msk.bf16.vlgmr.msrb.gmra.mxu3 %vm555_vm0, %v542_v18 }
  0x83   : >> { %1991 = vmatmul.msk.bf16.vlgmr.msra.gmra.mxu0 %vm555_vm0, %v542_v18  ;;  %1992 = vmatmul.msk.bf16.vlgmr.msra.gmra.mxu1 %vm555_vm0, %v542_v18 }
  0x86   : >> { %1993 = vmatmul.msk.bf16.vlgmr.msra.gmra.mxu2 %vm555_vm0, %v542_v18  ;;  %1994 = vmatmul.msk.bf16.vlgmr.msra.gmra.mxu3 %vm555_vm0, %v542_v18 }
  0xe0   : >> { %v571_v27 = vpop.f32.mrf.mxu0  ;;  %v587_v28 = vpop.f32.mrf.mxu1 }
  0xe1   : >> { %v588_v49 = vadd.f32 %v2178_v41, %v587_v28  ;;  %v572_v52 = vadd.f32 %v2177_v44, %v571_v27 }
  0xe3   : >> { %v776_v57 = vpack.c.bf16 %v588_v49, %v588_v49  ;;  %v775_v62 = vpack.c.bf16 %v572_v52, %v572_v52 }
  0xe8   : >> { %v573_v31 = vpop.f32.mrf.mxu0  ;;  %v589_v32 = vpop.f32.mrf.mxu1 }
  0xe9   : >> { %v603_v29 = vpop.f32.mrf.mxu2  ;;  %v619_v30 = vpop.f32.mrf.mxu3 }
  0xea   : >> { %v604_v3 = vadd.f32 %v2179_v58, %v603_v29  ;;  %v620_v4 = vadd.f32 %v2180_v59, %v619_v30 }
  0xec   : >> { %v777_v7 = vpack.c.bf16 %v604_v3, %v604_v3  ;;  %v778_v8 = vpack.c.bf16 %v620_v4, %v620_v4 }
  0xf0   : >> { %v647_v37 = vpop.f32.mrf.mxu0  ;;  %v663_v38 = vpop.f32.mrf.mxu1 }
  0xf1   : >> { %v605_v35 = vpop.f32.mrf.mxu2  ;;  %v621_v36 = vpop.f32.mrf.mxu3  ;;  %v648_v39 = vadd.f32 %v2181_v33, %v647_v37  ;;  %v664_v40 = vadd.f32 %v2182_v34, %v663_v38 }
  0xf3   : >> { %v779_v42 = vpack.c.bf16 %v648_v39, %v648_v39  ;;  %v780_v43 = vpack.c.bf16 %v664_v40, %v664_v40 }
  0xf5   : >> { %v788_v47 = vsel %vm783_vm1, %v779_v42, 0  ;;  %v807_v48 = vsel %vm783_vm1, %v780_v43, 0 }
  0xf6   : >> { %797 = vmatpush.bf16.xpose.msrb.mxu0 %v788_v47  ;;  %816 = vmatpush.bf16.xpose.msrb.mxu1 %v807_v48 }
  0xf8   : >> { %v649_v55 = vpop.f32.mrf.mxu0  ;;  %v665_v56 = vpop.f32.mrf.mxu1 }
  0xf9   : >> { %v679_v50 = vpop.f32.mrf.mxu2  ;;  %v695_v51 = vpop.f32.mrf.mxu3 }
  0xfa   : >> { %v680_v53 = vadd.f32 %v2183_v45, %v679_v50  ;;  %v696_v54 = vadd.f32 %v2184_v46, %v695_v51 }
  0xfc   : >> { %v781_v60 = vpack.c.bf16 %v680_v53, %v680_v53  ;;  %v782_v61 = vpack.c.bf16 %v696_v54, %v696_v54 }
  0xfd   : >> { %1995 = vmatmul.msk.bf16.vlgmr.msrb.gmra.mxu0 %vm783_vm1, %v775_v62  ;;  %1996 = vmatmul.msk.bf16.vlgmr.msrb.gmra.mxu1 %vm783_vm1, %v776_v57 }
  0xfe   : >> { %v826_v63 = vsel %vm783_vm1, %v781_v60, 0  ;;  %v845_v2 = vsel %vm783_vm1, %v782_v61, 0 }
  0xff   : >> { %835 = vmatpush.bf16.xpose.msrb.mxu2 %v826_v63  ;;  %854 = vmatpush.bf16.xpose.msrb.mxu3 %v845_v2 }
 0x100   : >> { %v723_v11 = vpop.f32.mrf.mxu0  ;;  %v739_v12 = vpop.f32.mrf.mxu1 }
 0x101   : >> { %v681_v5 = vpop.f32.mrf.mxu2  ;;  %v697_v6 = vpop.f32.mrf.mxu3  ;;  %v724_v13 = vadd.f32 %v2185_v9, %v723_v11  ;;  %v740_v14 = vadd.f32 %v2186_v10, %v739_v12 }
 0x103   : >> { %v912_v16 = vpack.c.bf16 %v724_v13, %v724_v13  ;;  %v913_v17 = vpack.c.bf16 %v740_v14, %v740_v14 }
 0x105   : >> { %v921_v19 = vsel %vm919_vm2, %v912_v16, 0  ;;  %v940_v20 = vsel %vm919_vm2, %v913_v17, 0 }
 0x106   : >> { %1997 = vmatmul.msk.bf16.vlgmr.msrb.gmra.mxu2 %vm783_vm1, %v777_v7  ;;  %1998 = vmatmul.msk.bf16.vlgmr.msrb.gmra.mxu3 %vm783_vm1, %v778_v8 }
 0x107   : >> { %930 = vmatpush.bf16.msra.mxu0 %v921_v19  ;;  %949 = vmatpush.bf16.msra.mxu1 %v940_v20 }
 0x108   : >> { %v725_v23 = vpop.f32.mrf.mxu0  ;;  %v741_v24 = vpop.f32.mrf.mxu1 }
 0x109   : >> { %v755_v18 = vpop.f32.mrf.mxu2  ;;  %v771_v27 = vpop.f32.mrf.mxu3  ;;  %v530_v23 = vld [vmem:[%s2813_s29] sm:$0xf] }
 0x10a   : >> { %v756_v21 = vadd.f32 %v2187_v15, %v755_v18  ;;  %v772_v29 = vadd.f32 %v2188_v25, %v771_v27  ;;  %v1001_v24 = vsel %vm919_vm2, %v530_v23, 0  ;;  %v531_v25 = vld [vmem:[%s2813_s29 + $0x4] sm:$0xf]  ;;  %v532_v27 = vld [vmem:[%s2813_s29 + $0x8] sm:$0xf] }
 0x10b   : >> { %1010 = vmatpush.bf16.msrb.mxu0 %v1001_v24 }
 0x10c   : >> { %v914_v22 = vpack.c.bf16 %v756_v21, %v756_v21  ;;  %v915_v30 = vpack.c.bf16 %v772_v29, %v772_v29  ;;  %v533_v29 = vld [vmem:[%s2813_s29 + $0xc] sm:$0xf] }
 0x10e   : >> { %v959_v26 = vsel %vm919_vm2, %v914_v22, 0  ;;  %v978_v31 = vsel %vm919_vm2, %v915_v30, 0  ;;  %v1058_v30 = vsel %vm919_vm2, %v533_v29, 0 }
 0x10f   : >> { %968 = vmatpush.bf16.msra.mxu2 %v959_v26  ;;  %987 = vmatpush.bf16.msra.mxu3 %v978_v31  ;;  %v1020_v26 = vsel %vm919_vm2, %v531_v25, 0  ;;  %v497_v25 = vld [vmem:[%s2729_s23 + $0x4c] sm:$0xf] }
 0x110   : >> { %1029 = vmatpush.bf16.msrb.mxu1 %v1020_v26  ;;  %v1258_v26 = vsel %vm555_vm0, %v497_v25, 0 }
 0x111   : >> { %v757_v28 = vpop.f32.mrf.mxu2  ;;  %v773_v32 = vpop.f32.mrf.mxu3 }
 0x112   : >> { %v1039_v28 = vsel %vm919_vm2, %v532_v27, 0 }
 0x113   : >> { %1048 = vmatpush.bf16.msrb.mxu2 %v1039_v28  ;;  %1067 = vmatpush.bf16.msrb.mxu3 %v1058_v30 }
 0x17a   : >> { %v799_v33 = vpop.f32.mrf.mxu0  ;;  %v818_v34 = vpop.f32.mrf.mxu1 }
 0x17b   : >> { %v860_v35 = vmul.f32 0.35355338, %v799_v33  ;;  %v861_v37 = vmul.f32 0.35355338, %v818_v34 }
 0x17d   : >> { %v864_v36 = vsel %vm783_vm1, %v860_v35, -inf  ;;  %v867_v40 = vsel %vm783_vm1, %v861_v37, -inf }
 0x17e   : >> { %865 = vmax.xlane.f32.xlu1 %v864_v36 }
 0x182   : >> { %v801_v38 = vpop.f32.mrf.mxu0  ;;  %v820_v39 = vpop.f32.mrf.mxu1 }
 0x186   : >> { %868 = vmax.xlane.f32.xlu1 %v867_v40 }
 0x189   : >> { %v837_v41 = vpop.f32.mrf.mxu2  ;;  %v856_v42 = vpop.f32.mrf.mxu3 }
 0x18a   : >> { %v862_v43 = vmul.f32 0.35355338, %v837_v41  ;;  %v863_v45 = vmul.f32 0.35355338, %v856_v42 }
 0x18c   : >> { %v870_v44 = vsel %vm783_vm1, %v862_v43, -inf  ;;  %v873_v48 = vsel %vm783_vm1, %v863_v45, -inf }
 0x18d   : >> { %871 = vmax.xlane.f32.xlu0 %v870_v44 }
 0x191   : >> { %v839_v46 = vpop.f32.mrf.mxu2  ;;  %v858_v47 = vpop.f32.mrf.mxu3 }
 0x195   : >> { %874 = vmax.xlane.f32.xlu0 %v873_v48 }
 0x1f1   : >> { %v866_v49 = vpop.xlane.xlu1 %865 }
 0x1f2   : >> { %v876_v50 = vsub.f32 %v860_v35, %v866_v49 }
 0x1f4   : >> { %v880_v51 = vmul.f32 1.442695, %v876_v50 }
 0x1f6   : >> { %2205 = vpow2.f32 %v880_v51 }
 0x1f9   : >> { %v869_v52 = vpop.xlane.xlu1 %868 }
 0x1fa   : >> { %v877_v53 = vsub.f32 %v861_v37, %v869_v52 }
 0x1fc   : >> { %v2206_v54 = vpop.eup %2205  ;;  %v882_v55 = vmul.f32 1.442695, %v877_v53 }
 0x1fd   : >> { %v888_v57 = vsel %vm783_vm1, %v2206_v54, 0.0 }
 0x1fe   : >> { %2207 = vpow2.f32 %v882_v55  ;;  %889 = vadd.xlane.f32.xlu0 %v888_v57  ;;  %v2189_v55 = vld [vmem:[%s2828_s24] ss:$0 sm:$0xff] }
 0x200   : >> { %v872_v56 = vpop.xlane.xlu0 %871 }
 0x201   : >> { %v878_v58 = vsub.f32 %v862_v43, %v872_v56 }
 0x203   : >> { %v884_v59 = vmul.f32 1.442695, %v878_v58 }
 0x204   : >> { %v2208_v60 = vpop.eup %2207 }
 0x205   : >> { %2209 = vpow2.f32 %v884_v59  ;;  %v891_v62 = vsel %vm783_vm1, %v2208_v60, 0.0 }
 0x206   : >> { %892 = vadd.xlane.f32.xlu1 %v891_v62  ;;  %v2498_v62 = vmov 32.0  }
 0x208   : >> { %v875_v61 = vpop.xlane.xlu0 %874 }
 0x209   : >> { %v879_v63 = vsub.f32 %v863_v45, %v875_v61 }
 0x20b   : >> { %v2210_v2 = vpop.eup %2209  ;;  %v886_v3 = vmul.f32 1.442695, %v879_v63 }
 0x20c   : >> { %v894_v4 = vsel %vm783_vm1, %v2210_v2, 0.0 }
 0x20d   : >> { %2211 = vpow2.f32 %v886_v3  ;;  %895 = vadd.xlane.f32.xlu2 %v894_v4 }
 0x213   : >> { %v2212_v5 = vpop.eup %2211 }
 0x214   : >> { %v897_v6 = vsel %vm783_vm1, %v2212_v5, 0.0 }
 0x215   : >> { %898 = vadd.xlane.f32.xlu2 %v897_v6 }
 0x271   : >> { %v890_v7 = vpop.xlane.xlu0 %889 }
 0x272   : >> { %2213 = vrcp.f32 %v890_v7 }
 0x278   : >> { %v2214_v8 = vpop.eup %2213 }
 0x279   : >> { %v904_v9 = vmul.f32 %v2214_v8, %v2206_v54  ;;  %v893_v10 = vpop.xlane.xlu1 %892 }
 0x27a   : >> { %2215 = vrcp.f32 %v893_v10 }
 0x27b   : >> { %v908_v11 = vpack.c.bf16 %v904_v9, %v904_v9 }
 0x27d   : >> { %1999 = vmatmul.msk.bf16.vlgmr.msra.gmra.mxu0 %vm783_vm1, %v908_v11  ;;  %v490_v11 = vld [vmem:[%s2729_s23 + $0x30] sm:$0xf] }
 0x280   : >> { %v896_v12 = vpop.xlane.xlu2 %895  ;;  %v2216_v13 = vpop.eup %2215 }
 0x281   : >> { %2217 = vrcp.f32 %v896_v12  ;;  %v905_v14 = vmul.f32 %v2216_v13, %v2208_v60  ;;  %v491_v12 = vld [vmem:[%s2729_s23 + $0x34] sm:$0xf]  ;;  %v492_v13 = vld [vmem:[%s2729_s23 + $0x38] sm:$0xf] }
 0x283   : >> { %v909_v15 = vpack.c.bf16 %v905_v14, %v905_v14  ;;  %v1131_v14 = vsel %vm555_vm0, %v490_v11, 0 }
 0x284   : >> { %1140 = vmatpush.bf16.xpose.msra.mxu0 %v1131_v14 }
 0x285   : >> { %2000 = vmatmul.msk.bf16.vlgmr.msra.gmra.mxu1 %vm783_vm1, %v909_v15  ;;  %v1147_v15 = vsel %vm555_vm0, %v491_v12, 0 }
 0x286   : >> { %1156 = vmatpush.bf16.xpose.msra.mxu1 %v1147_v15  ;;  %v2192_v15 = vld [vmem:[%s2747_s18 + $0xe] ss:$0 sm:$0xff] }
 0x287   : >> { %v2218_v16 = vpop.eup %2217 }
 0x288   : >> { %v906_v17 = vmul.f32 %v2218_v16, %v2210_v2  ;;  %v899_v18 = vpop.xlane.xlu2 %898  ;;  %v1163_v16 = vsel %vm555_vm0, %v492_v13, 0 }
 0x289   : >> { %2219 = vrcp.f32 %v899_v18 }
 0x28a   : >> { %v910_v19 = vpack.c.bf16 %v906_v17, %v906_v17  ;;  %2221 = vrcp.f32 %v2498_v62  ;;  %v493_v17 = vld [vmem:[%s2729_s23 + $0x3c] sm:$0xf] }
 0x28b   : >> { %v1179_v18 = vsel %vm555_vm0, %v493_v17, 0 }
 0x28c   : >> { %2001 = vmatmul.msk.bf16.vlgmr.msra.gmra.mxu2 %vm783_vm1, %v910_v19  ;;  %v494_v19 = vld [vmem:[%s2729_s23 + $0x40] sm:$0xf] }
 0x28d   : >> { %1172 = vmatpush.bf16.xpose.msra.mxu2 %v1163_v16  ;;  %v2193_v16 = vld [vmem:[%s2747_s18 + $0xf] ss:$0 sm:$0xff] }
 0x28f   : >> { %v2220_v20 = vpop.eup %2219 }
 0x290   : >> { %v907_v21 = vmul.f32 %v2220_v20, %v2212_v5  ;;  %v2222_v63 = vpop.eup %2221  ;;  %v495_v20 = vld [vmem:[%s2729_s23 + $0x44] sm:$0xf] }
 0x291   : >> { %v1089_v2 = vmul.f32 32.0, %v2222_v63  ;;  %vm1093_vm3 = vweird.f32 %v2222_v63  ;;  %v1226_v23 = vsel %vm555_vm0, %v495_v20, 0 }
 0x292   : >> { %v911_v22 = vpack.c.bf16 %v907_v21, %v907_v21  ;;  %v496_v21 = vld [vmem:[%s2729_s23 + $0x48] sm:$0xf] }
 0x293   : >> { %v1090_v3 = vsub.f32 1.0, %v1089_v2  ;;  %v1242_v24 = vsel %vm555_vm0, %v496_v21, 0  ;;  %v2191_v2 = vld [vmem:[%s2747_s18 + $0xd] ss:$0 sm:$0xff] }
 0x294   : >> { %2002 = vmatmul.msk.bf16.vlgmr.msra.gmra.mxu3 %vm783_vm1, %v911_v22  ;;  %v1210_v22 = vsel %vm555_vm0, %v494_v19, 0 }
 0x295   : >> { %v1091_v4 = vmul.f32 %v2222_v63, %v1090_v3  ;;  %1188 = vmatpush.bf16.xpose.msra.mxu3 %v1179_v18  ;;  %v2196_v3 = vld [vmem:[%s2747_s18 + $0x12] ss:$0 sm:$0xff] }
 0x297   : >> { %v1092_v5 = vadd.f32 %v2222_v63, %v1091_v4  ;;  %v2197_v4 = vld [vmem:[%s2747_s18 + $0x13] ss:$0 sm:$0xff] }
 0x299   : >> { %v2837_v6 = vsel %vm1093_vm3, %v2222_v63, %v1092_v5 }
 0x2fa   : >> { %v932_v31 = vpop.f32.mrf.mxu0 }
 0x2fb   : >> { %v993_v32 = vpack.c.bf16 %v932_v31, %v932_v31 }
 0x2fd   : >> { %2003 = vmatmul.msk.bf16.vlgmr.msrb.gmra.mxu0 %vm783_vm1, %v993_v32 }
 0x2fe   : >> { %1219 = vmatpush.bf16.xpose.msrb.mxu0 %v1210_v22 }
 0x302   : >> { %v934_v33 = vpop.f32.mrf.mxu0  ;;  %v951_v34 = vpop.f32.mrf.mxu1 }
 0x303   : >> { %v994_v35 = vpack.c.bf16 %v951_v34, %v951_v34 }
 0x305   : >> { %2004 = vmatmul.msk.bf16.vlgmr.msrb.gmra.mxu1 %vm783_vm1, %v994_v35 }
 0x306   : >> { %1235 = vmatpush.bf16.xpose.msrb.mxu1 %v1226_v23 }
 0x30a   : >> { %v953_v36 = vpop.f32.mrf.mxu1 }
 0x30f   : >> { %v970_v37 = vpop.f32.mrf.mxu2 }
 0x310   : >> { %v995_v38 = vpack.c.bf16 %v970_v37, %v970_v37 }
 0x312   : >> { %2005 = vmatmul.msk.bf16.vlgmr.msrb.gmra.mxu2 %vm783_vm1, %v995_v38 }
 0x313   : >> { %1251 = vmatpush.bf16.xpose.msrb.mxu2 %v1242_v24 }
 0x317   : >> { %v972_v39 = vpop.f32.mrf.mxu2  ;;  %v989_v40 = vpop.f32.mrf.mxu3 }
 0x318   : >> { %v996_v41 = vpack.c.bf16 %v989_v40, %v989_v40  ;;  %v500_v39 = vld [vmem:[%s2729_s23 + $0x58] sm:$0xf] }
 0x319   : >> { %v1318_v40 = vsel %vm555_vm0, %v500_v39, 0 }
 0x31a   : >> { %2006 = vmatmul.msk.bf16.vlgmr.msrb.gmra.mxu3 %vm783_vm1, %v996_v41  ;;  %v498_v41 = vld [vmem:[%s2729_s23 + $0x50] sm:$0xf] }
 0x31b   : >> { %1267 = vmatpush.bf16.xpose.msrb.mxu3 %v1258_v26 }
 0x31f   : >> { %v991_v42 = vpop.f32.mrf.mxu3 }
 0x320   : >> { %v499_v42 = vld [vmem:[%s2729_s23 + $0x54] sm:$0xf] }
 0x37a   : >> { %v1012_v43 = vpop.f32.mrf.mxu0 }
 0x37b   : >> { %v1073_v49 = vsel %vm555_vm0, %v1012_v43, 0.0  ;;  %v501_v43 = vld [vmem:[%s2729_s23 + $0x5c] sm:$0xf]  ;;  %s1723_s23 = scalar_lea.vmem %s3024_s8, %s2065_s22 }
 0x382   : >> { %v1014_v44 = vpop.f32.mrf.mxu0  ;;  %v1031_v45 = vpop.f32.mrf.mxu1 }
 0x383   : >> { %v1074_v48 = vsel %vm555_vm0, %v1031_v45, 0.0  ;;  %v1286_v44 = vsel %vm555_vm0, %v498_v41, 0  ;;  %v1302_v45 = vsel %vm555_vm0, %v499_v42, 0 }
 0x384   : >> { %v1075_v51 = vadd.f32 %v1074_v48, %v1073_v49 }
 0x38a   : >> { %v1033_v46 = vpop.f32.mrf.mxu1 }
 0x38b   : >> { %v1334_v46 = vsel %vm555_vm0, %v501_v43, 0 }
 0x395   : >> { %v1050_v47 = vpop.f32.mrf.mxu2 }
 0x396   : >> { %v1076_v50 = vsel %vm555_vm0, %v1050_v47, 0.0 }
 0x397   : >> { %v1077_v52 = vadd.f32 %v1076_v50, %v1075_v51 }
 0x39d   : >> { %v1052_v53 = vpop.f32.mrf.mxu2  ;;  %v1069_v54 = vpop.f32.mrf.mxu3 }
 0x39e   : >> { %v1078_v56 = vsel %vm555_vm0, %v1069_v54, 0.0  ;;  %v2194_v53 = vld [vmem:[%s2747_s18 + $0x10] ss:$0 sm:$0xff]  ;;  %v2195_v54 = vld [vmem:[%s2747_s18 + $0x11] ss:$0 sm:$0xff] }
 0x39f   : >> { %v1079_v57 = vadd.f32 %v1078_v56, %v1077_v52 }
 0x3a1   : >> { %v1083_v58 = vadd.f32 %v2189_v55, %v1079_v57 }
 0x3a3   : >> { %v1084_v59 = vadd.f32 %v2485_v1, %v1083_v58 }
 0x3a5   : >> { %v1071_v60 = vpop.f32.mrf.mxu3  ;;  %v1085_v61 = vsel %vm555_vm0, %v1084_v59, 0.0 }
 0x3a6   : >> { %1086 = vadd.xlane.f32.xlu2 %v1085_v61  ;;  %v2190_v61 = vld [vmem:[%s2747_s18 + $0xc] ss:$0 sm:$0xff] }
 0x419   : >> { %v1087_v7 = vpop.xlane.xlu2 %1086 }
 0x41a   : >> { %v1095_v1 = vmul.f32 %v2837_v6, %v1087_v7 }
 0x41c   : >> { %v1096_v8 = vsub.f32 %v1084_v59, %v1095_v1 }
 0x41e   : >> { %v1097_v9 = vmul.f32 %v1096_v8, %v1096_v8 }
 0x420   : >> { %v1098_v10 = vsel %vm555_vm0, %v1097_v9, 0.0 }
 0x421   : >> { %1099 = vadd.xlane.f32.xlu0 %v1098_v10 }
 0x494   : >> { %v1100_v27 = vpop.xlane.xlu0 %1099 }
 0x495   : >> { %v1101_v28 = vmul.f32 %v1100_v27, %v2837_v6 }
 0x497   : >> { %v1102_v29 = vadd.f32 1e-05, %v1101_v28 }
 0x499   : >> { %2223 = vrsqrt.f32 %v1102_v29  ;;  %vm1109_vm5 = vweird.f32 %v1102_v29 }
 0x49f   : >> { %v2224_v30 = vpop.eup %2223 }
 0x4a0   : >> { %v1104_v31 = vmul.f32 %v2224_v30, %v1102_v29  ;;  %vm1110_vm4 = vweird.f32 %v2224_v30  ;;  %v2198_v29 = vld [vmem:[%s2747_s18 + $0x14] ss:$0 sm:$0xff] }
 0x4a1   : >> { %vm1111_vm6 = vmor %vm1109_vm5, %vm1110_vm4 }
 0x4a2   : >> { %v1105_v32 = vmul.f32 %v2224_v30, %v1104_v31 }
 0x4a4   : >> { %v1106_v33 = vmul.f32 0.5, %v1105_v32 }
 0x4a6   : >> { %v1107_v34 = vsub.f32 1.5, %v1106_v33 }
 0x4a8   : >> { %v1108_v35 = vmul.f32 %v2224_v30, %v1107_v34 }
 0x4aa   : >> { %v1112_v36 = vsel %vm1111_vm6, %v2224_v30, %v1108_v35  ;;  %v2199_v30 = vld [vmem:[%s2747_s18 + $0x15] ss:$0 sm:$0xff]  ;;  %v2200_v35 = vld [vmem:[%s2747_s18 + $0x16] ss:$0 sm:$0xff] }
 0x4ab   : >> { %v2858_v37 = vmul.f32 %v1112_v36, %v1096_v8 }
 0x4ad   : >> { %v1114_v38 = vpack.c.bf16 %v2858_v37, %v2858_v37 }
 0x4af   : >> { %2007 = vmatmul.msk.bf16.vlgmr.msra.gmra.mxu0 %vm555_vm0, %v1114_v38  ;;  %2008 = vmatmul.msk.bf16.vlgmr.msra.gmra.mxu1 %vm555_vm0, %v1114_v38 }
 0x4b0   : >> { %2009 = vmatmul.msk.bf16.vlgmr.msra.gmra.mxu2 %vm555_vm0, %v1114_v38  ;;  %2010 = vmatmul.msk.bf16.vlgmr.msra.gmra.mxu3 %vm555_vm0, %v1114_v38 }
 0x4b1   : >> { %1327 = vmatpush.bf16.xpose.msra.mxu2 %v1318_v40  ;;  %1295 = vmatpush.bf16.xpose.msra.mxu0 %v1286_v44  ;;  %v2201_v40 = vld [vmem:[%s2747_s18 + $0x17] ss:$0 sm:$0xff] }
 0x4b2   : >> { %1311 = vmatpush.bf16.xpose.msra.mxu1 %v1302_v45  ;;  %1343 = vmatpush.bf16.xpose.msra.mxu3 %v1334_v46 }
 0x4bf   : >> { %2011 = vmatmul.msk.bf16.vlgmr.msrb.gmra.mxu0 %vm555_vm0, %v2713_v0  ;;  %2012 = vmatmul.msk.bf16.vlgmr.msrb.gmra.mxu1 %vm555_vm0, %v2713_v0 }
 0x4c0   : >> { %2013 = vmatmul.msk.bf16.vlgmr.msrb.gmra.mxu2 %vm555_vm0, %v2713_v0  ;;  %2014 = vmatmul.msk.bf16.vlgmr.msrb.gmra.mxu3 %vm555_vm0, %v2713_v0 }
 0x4cf   : >> { %2015 = vmatmul.msk.bf16.vlgmr.msra.gmra.mxu0 %vm555_vm0, %v2713_v0  ;;  %2016 = vmatmul.msk.bf16.vlgmr.msra.gmra.mxu1 %vm555_vm0, %v2713_v0 }
 0x4d0   : >> { %2017 = vmatmul.msk.bf16.vlgmr.msra.gmra.mxu2 %vm555_vm0, %v2713_v0  ;;  %2018 = vmatmul.msk.bf16.vlgmr.msra.gmra.mxu3 %vm555_vm0, %v2713_v0 }
 0x52c   : >> { %v1142_v47 = vpop.f32.mrf.mxu0  ;;  %v1158_v48 = vpop.f32.mrf.mxu1 }
 0x52d   : >> { %v1143_v9 = vadd.f32 %v2190_v61, %v1142_v47  ;;  %v1159_v10 = vadd.f32 %v2191_v2, %v1158_v48 }
 0x52f   : >> { %v1349_v19 = vpack.c.bf16 %v1143_v9, %v1143_v9  ;;  %v1350_v20 = vpack.c.bf16 %v1159_v10, %v1159_v10 }
 0x533   : >> { %v1174_v49 = vpop.f32.mrf.mxu2  ;;  %v1190_v50 = vpop.f32.mrf.mxu3 }
 0x534   : >> { %v1144_v51 = vpop.f32.mrf.mxu0  ;;  %v1160_v52 = vpop.f32.mrf.mxu1  ;;  %v1175_v23 = vadd.f32 %v2192_v15, %v1174_v49  ;;  %v1191_v24 = vadd.f32 %v2193_v16, %v1190_v50 }
 0x536   : >> { %v1351_v27 = vpack.c.bf16 %v1175_v23, %v1175_v23  ;;  %v1352_v28 = vpack.c.bf16 %v1191_v24, %v1191_v24 }
 0x53b   : >> { %v1176_v55 = vpop.f32.mrf.mxu2  ;;  %v1192_v56 = vpop.f32.mrf.mxu3 }
 0x53c   : >> { %v1221_v57 = vpop.f32.mrf.mxu0  ;;  %v1237_v58 = vpop.f32.mrf.mxu1 }
 0x53d   : >> { %v1222_v59 = vadd.f32 %v2194_v53, %v1221_v57  ;;  %v1238_v60 = vadd.f32 %v2195_v54, %v1237_v58 }
 0x53f   : >> { %v1353_v62 = vpack.c.bf16 %v1222_v59, %v1222_v59  ;;  %v1354_v63 = vpack.c.bf16 %v1238_v60, %v1238_v60 }
 0x541   : >> { %v1361_v5 = vsel %vm783_vm1, %v1353_v62, 0  ;;  %v1380_v7 = vsel %vm783_vm1, %v1354_v63, 0 }
 0x542   : >> { %1370 = vmatpush.bf16.xpose.msrb.mxu0 %v1361_v5  ;;  %1389 = vmatpush.bf16.xpose.msrb.mxu1 %v1380_v7 }
 0x543   : >> { %v1253_v1 = vpop.f32.mrf.mxu2  ;;  %v1269_v8 = vpop.f32.mrf.mxu3 }
 0x544   : >> { %v1254_v11 = vadd.f32 %v2196_v3, %v1253_v1  ;;  %v1270_v12 = vadd.f32 %v2197_v4, %v1269_v8  ;;  %v1223_v13 = vpop.f32.mrf.mxu0  ;;  %v1239_v14 = vpop.f32.mrf.mxu1 }
 0x546   : >> { %v1355_v17 = vpack.c.bf16 %v1254_v11, %v1254_v11  ;;  %v1356_v18 = vpack.c.bf16 %v1270_v12, %v1270_v12 }
 0x548   : >> { %v1399_v21 = vsel %vm783_vm1, %v1355_v17, 0  ;;  %v1418_v22 = vsel %vm783_vm1, %v1356_v18, 0 }
 0x549   : >> { %1408 = vmatpush.bf16.xpose.msrb.mxu2 %v1399_v21  ;;  %1427 = vmatpush.bf16.xpose.msrb.mxu3 %v1418_v22 }
 0x54a   : >> { %2019 = vmatmul.msk.bf16.vlgmr.msrb.gmra.mxu0 %vm783_vm1, %v1349_v19  ;;  %2020 = vmatmul.msk.bf16.vlgmr.msrb.gmra.mxu1 %vm783_vm1, %v1350_v20 }
 0x54b   : >> { %v1255_v25 = vpop.f32.mrf.mxu2  ;;  %v1271_v26 = vpop.f32.mrf.mxu3 }
 0x54c   : >> { %v1297_v31 = vpop.f32.mrf.mxu0  ;;  %v1313_v32 = vpop.f32.mrf.mxu1 }
 0x54d   : >> { %v1298_v33 = vadd.f32 %v2198_v29, %v1297_v31  ;;  %v1314_v34 = vadd.f32 %v2199_v30, %v1313_v32 }
 0x54f   : >> { %v1485_v36 = vpack.c.bf16 %v1298_v33, %v1298_v33  ;;  %v1486_v38 = vpack.c.bf16 %v1314_v34, %v1314_v34 }
 0x550   : >> { %2021 = vmatmul.msk.bf16.vlgmr.msrb.gmra.mxu2 %vm783_vm1, %v1351_v27  ;;  %2022 = vmatmul.msk.bf16.vlgmr.msrb.gmra.mxu3 %vm783_vm1, %v1352_v28 }
 0x551   : >> { %v1493_v41 = vsel %vm919_vm2, %v1485_v36, 0  ;;  %v1512_v42 = vsel %vm919_vm2, %v1486_v38, 0 }
 0x552   : >> { %1502 = vmatpush.bf16.msra.mxu0 %v1493_v41  ;;  %1521 = vmatpush.bf16.msra.mxu1 %v1512_v42 }
 0x553   : >> { %v1329_v39 = vpop.f32.mrf.mxu2  ;;  %v1345_v45 = vpop.f32.mrf.mxu3 }
 0x554   : >> { %v1330_v43 = vadd.f32 %v2200_v35, %v1329_v39  ;;  %v1299_v46 = vpop.f32.mrf.mxu0  ;;  %v1315_v47 = vpop.f32.mrf.mxu1  ;;  %v1346_v48 = vadd.f32 %v2201_v40, %v1345_v45  ;;  %v534_v45 = vld [vmem:[%s2813_s29 + $0x10] sm:$0xf] }
 0x555   : >> { %v1573_v46 = vsel %vm919_vm2, %v534_v45, 0  ;;  %v536_v47 = vld [vmem:[%s2813_s29 + $0x18] sm:$0xf]  ;;  %v2203_v45 = vld [vmem:[%s1687_s25] ss:$0 sm:$0xff]  ;;  %s3054_s25 = smov (%p470_p1), %s3053_s13 }
 0x556   : >> { %v1487_v44 = vpack.c.bf16 %v1330_v43, %v1330_v43  ;;  %v1488_v50 = vpack.c.bf16 %v1346_v48, %v1346_v48  ;;  %1582 = vmatpush.bf16.msrb.mxu0 %v1573_v46  ;;  %v537_v48 = vld [vmem:[%s2813_s29 + $0x1c] sm:$0xf]  ;;  %s2415_s20 = scalar_lea.hbm (%p470_p1), %s3054_s25, 16  ;;  %p2416_p9 = scmp.lt.s32.totalorder (%p470_p1), %s2410_s2, %s3054_s25 }
 0x557   : > { %p2417_p5 = scmp.lt.s32.totalorder (%p470_p1), %s2415_s20, %s2411_s27 }
 0x558   : >> { %v1531_v49 = vsel %vm919_vm2, %v1487_v44, 0  ;;  %v1550_v51 = vsel %vm919_vm2, %v1488_v50, 0  ;;  %v1630_v50 = vsel %vm919_vm2, %v537_v48, 0 }
 0x559   : >> { %1540 = vmatpush.bf16.msra.mxu2 %v1531_v49  ;;  %1559 = vmatpush.bf16.msra.mxu3 %v1550_v51  ;;  %v1611_v49 = vsel %vm919_vm2, %v536_v47, 0  ;;  %v535_v51 = vld [vmem:[%s2813_s29 + $0x14] sm:$0xf]  ;;  %p2418_p8 = por (%p470_p1), %p2417_p5, %p2416_p9 }
 0x55b   : >> { %v1331_v52 = vpop.f32.mrf.mxu2  ;;  %v1347_v53 = vpop.f32.mrf.mxu3  ;;  %p2419_p10 = pnand (%p470_p1), %p2418_p8, %p2414_p7 }
 0x55c   : >> { %v1592_v52 = vsel %vm919_vm2, %v535_v51, 0  ;;  %v2204_v51 = vld [vmem:[%s1732_s3] ss:$0 sm:$0xff] }
 0x55d   : >> { %1620 = vmatpush.bf16.msrb.mxu2 %v1611_v49  ;;  %1639 = vmatpush.bf16.msrb.mxu3 %v1630_v50 }
 0x55e   : >> { %1601 = vmatpush.bf16.msrb.mxu1 %v1592_v52 }
 0x5c7   : >> { %v1372_v54 = vpop.f32.mrf.mxu0  ;;  %v1391_v55 = vpop.f32.mrf.mxu1 }
 0x5c8   : >> { %v1433_v56 = vmul.f32 0.35355338, %v1372_v54  ;;  %v1434_v4 = vmul.f32 0.35355338, %v1391_v55 }
 0x5ca   : >> { %v1437_v57 = vsel %vm783_vm1, %v1433_v56, -inf  ;;  %v1440_v1 = vsel %vm783_vm1, %v1434_v4, -inf }
 0x5cb   : >> { %1438 = vmax.xlane.f32.xlu0 %v1437_v57 }
 0x5cf   : >> { %v1374_v58 = vpop.f32.mrf.mxu0  ;;  %v1393_v59 = vpop.f32.mrf.mxu1 }
 0x5d3   : >> { %v1410_v60 = vpop.f32.mrf.mxu2  ;;  %v1429_v61 = vpop.f32.mrf.mxu3 }
 0x5d4   : >> { %v1435_v62 = vmul.f32 0.35355338, %v1410_v60  ;;  %v1436_v63 = vmul.f32 0.35355338, %v1429_v61 }
 0x5d6   : >> { %v1446_v2 = vsel %vm783_vm1, %v1436_v63, -inf  ;;  %v1443_v3 = vsel %vm783_vm1, %v1435_v62, -inf }
 0x5d7   : >> { %1447 = vmax.xlane.f32.xlu2 %v1446_v2  ;;  %1444 = vmax.xlane.f32.xlu1 %v1443_v3 }
 0x5db   : >> { %v1412_v5 = vpop.f32.mrf.mxu2  ;;  %v1431_v7 = vpop.f32.mrf.mxu3 }
 0x5df   : >> { %1441 = vmax.xlane.f32.xlu1 %v1440_v1 }
 0x63e   : >> { %v1439_v8 = vpop.xlane.xlu0 %1438 }
 0x63f   : >> { %v1449_v9 = vsub.f32 %v1433_v56, %v1439_v8 }
 0x641   : >> { %v1453_v10 = vmul.f32 1.442695, %v1449_v9 }
 0x643   : >> { %2225 = vpow2.f32 %v1453_v10 }
 0x649   : >> { %v2226_v11 = vpop.eup %2225 }
 0x64a   : >> { %v1448_v12 = vpop.xlane.xlu2 %1447  ;;  %v1445_v13 = vpop.xlane.xlu1 %1444  ;;  %v1461_v14 = vsel %vm783_vm1, %v2226_v11, 0.0 }
 0x64b   : >> { %v1452_v15 = vsub.f32 %v1436_v63, %v1448_v12  ;;  %v1451_v16 = vsub.f32 %v1435_v62, %v1445_v13  ;;  %1462 = vadd.xlane.f32.xlu1 %v1461_v14  ;;  %v2202_v13 = vld [vmem:[%s2828_s24 + $0x1] ss:$0 sm:$0xff] }
 0x64d   : >> { %v1459_v17 = vmul.f32 1.442695, %v1452_v15  ;;  %v1457_v18 = vmul.f32 1.442695, %v1451_v16 }
 0x64f   : >> { %2227 = vpow2.f32 %v1459_v17 }
 0x650   : >> { %2229 = vpow2.f32 %v1457_v18 }
 0x652   : >> { %v1442_v19 = vpop.xlane.xlu1 %1441 }
 0x653   : >> { %v1450_v20 = vsub.f32 %v1434_v4, %v1442_v19 }
 0x655   : >> { %v2228_v21 = vpop.eup %2227  ;;  %v1455_v22 = vmul.f32 1.442695, %v1450_v20 }
 0x656   : >> { %v2230_v23 = vpop.eup %2229  ;;  %v1470_v24 = vsel %vm783_vm1, %v2228_v21, 0.0 }
 0x657   : >> { %2231 = vpow2.f32 %v1455_v22  ;;  %v1467_v25 = vsel %vm783_vm1, %v2230_v23, 0.0  ;;  %1471 = vadd.xlane.f32.xlu0 %v1470_v24 }
 0x658   : >> { %1468 = vadd.xlane.f32.xlu2 %v1467_v25 }
 0x65d   : >> { %v2232_v26 = vpop.eup %2231 }
 0x65e   : >> { %v1464_v27 = vsel %vm783_vm1, %v2232_v26, 0.0 }
 0x660   : >> { %1465 = vadd.xlane.f32.xlu2 %v1464_v27  ;;  %v2067_v27 = vld [vmem:[%s1682_s28] sm:$0xff] }
 0x6be   : >> { %v1463_v28 = vpop.xlane.xlu1 %1462 }
 0x6bf   : >> { %2233 = vrcp.f32 %v1463_v28  ;;  %v2073_v28 = vld [vmem:[%s1723_s23 + $0x18] sm:$0xff] }
 0x6c5   : >> { %v2234_v29 = vpop.eup %2233 }
 0x6c6   : >> { %v1477_v30 = vmul.f32 %v2234_v29, %v2226_v11  ;;  %v2072_v29 = vld [vmem:[%s1723_s23 + $0x10] sm:$0xff] }
 0x6c8   : >> { %v1481_v31 = vpack.c.bf16 %v1477_v30, %v1477_v30 }
 0x6ca   : >> { %2023 = vmatmul.msk.bf16.vlgmr.msra.gmra.mxu0 %vm783_vm1, %v1481_v31  ;;  %v1472_v32 = vpop.xlane.xlu0 %1471 }
 0x6cb   : >> { %v1469_v33 = vpop.xlane.xlu2 %1468  ;;  %2235 = vrcp.f32 %v1472_v32 }
 0x6cc   : >> { %2237 = vrcp.f32 %v1469_v33 }
 0x6d1   : >> { %v2236_v34 = vpop.eup %2235 }
 0x6d2   : >> { %v2238_v35 = vpop.eup %2237  ;;  %v1480_v36 = vmul.f32 %v2236_v34, %v2228_v21 }
 0x6d3   : >> { %v1479_v38 = vmul.f32 %v2238_v35, %v2230_v23  ;;  %v1466_v39 = vpop.xlane.xlu2 %1465 }
 0x6d4   : >> { %v1484_v40 = vpack.c.bf16 %v1480_v36, %v1480_v36  ;;  %2239 = vrcp.f32 %v1466_v39 }
 0x6d5   : >> { %v1483_v41 = vpack.c.bf16 %v1479_v38, %v1479_v38 }
 0x6d6   : >> { %2026 = vmatmul.msk.bf16.vlgmr.msra.gmra.mxu3 %vm783_vm1, %v1484_v40 }
 0x6d7   : >> { %2025 = vmatmul.msk.bf16.vlgmr.msra.gmra.mxu2 %vm783_vm1, %v1483_v41 }
 0x6da   : >> { %v2240_v42 = vpop.eup %2239 }
 0x6db   : >> { %v1478_v43 = vmul.f32 %v2240_v42, %v2232_v26 }
 0x6dd   : >> { %v1482_v44 = vpack.c.bf16 %v1478_v43, %v1478_v43  ;;  %v2071_v43 = vld [vmem:[%s1723_s23 + $0x8] sm:$0xff] }
 0x6df   : >> { %2024 = vmatmul.msk.bf16.vlgmr.msra.gmra.mxu1 %vm783_vm1, %v1482_v44  ;;  %v2070_v44 = vld [vmem:[%s1723_s23] sm:$0xff] }
 0x6e0   : >> { %1769 = vmatpush.bf16.msra.mxu1 %v2073_v28 }
 0x6e4   : >> { %1770 = vmatpush.bf16.msra.mxu1 %v2072_v29 }
 0x6e8   : >> { %1771 = vmatpush.bf16.msra.mxu1 %v2071_v43 }
 0x6ec   : >> { %1772 = vmatpush.bf16.msra.mxu1 %v2070_v44 }
 0x747   : >> { %v1504_v53 = vpop.f32.mrf.mxu0 }
 0x748   : >> { %v1565_v54 = vpack.c.bf16 %v1504_v53, %v1504_v53 }
 0x74a   : >> { %2027 = vmatmul.msk.bf16.vlgmr.msrb.gmra.mxu0 %vm783_vm1, %v1565_v54 }
 0x74f   : >> { %v1506_v55 = vpop.f32.mrf.mxu0 }
 0x759   : >> { %v1561_v56 = vpop.f32.mrf.mxu3 }
 0x75a   : >> { %v1542_v57 = vpop.f32.mrf.mxu2  ;;  %v1568_v58 = vpack.c.bf16 %v1561_v56, %v1561_v56 }
 0x75b   : >> { %v1567_v59 = vpack.c.bf16 %v1542_v57, %v1542_v57 }
 0x75c   : >> { %v1523_v60 = vpop.f32.mrf.mxu1  ;;  %2030 = vmatmul.msk.bf16.vlgmr.msrb.gmra.mxu3 %vm783_vm1, %v1568_v58 }
 0x75d   : >> { %v1566_v61 = vpack.c.bf16 %v1523_v60, %v1523_v60  ;;  %2029 = vmatmul.msk.bf16.vlgmr.msrb.gmra.mxu2 %vm783_vm1, %v1567_v59 }
 0x75f   : >> { %2028 = vmatmul.msk.bf16.vlgmr.msrb.gmra.mxu1 %vm783_vm1, %v1566_v61 }
 0x761   : >> { %v1563_v62 = vpop.f32.mrf.mxu3 }
 0x762   : >> { %v1544_v63 = vpop.f32.mrf.mxu2 }
 0x764   : >> { %v1525_v2 = vpop.f32.mrf.mxu1 }
 0x7c7   : >> { %v1584_v3 = vpop.f32.mrf.mxu0 }
 0x7c8   : >> { %v1645_v1 = vsel %vm555_vm0, %v1584_v3, 0.0 }
 0x7cf   : >> { %v1586_v4 = vpop.f32.mrf.mxu0 }
 0x7dc   : >> { %v1603_v5 = vpop.f32.mrf.mxu1 }
 0x7dd   : >> { %v1646_v7 = vsel %vm555_vm0, %v1603_v5, 0.0 }
 0x7de   : >> { %v1647_v9 = vadd.f32 %v1646_v7, %v1645_v1 }
 0x7df   : >> { %v1641_v8 = vpop.f32.mrf.mxu3 }
 0x7e0   : >> { %v1622_v10 = vpop.f32.mrf.mxu2  ;;  %v1650_v14 = vsel %vm555_vm0, %v1641_v8, 0.0 }
 0x7e1   : >> { %v1648_v11 = vsel %vm555_vm0, %v1622_v10, 0.0 }
 0x7e2   : >> { %v1649_v12 = vadd.f32 %v1648_v11, %v1647_v9 }
 0x7e4   : >> { %v1651_v15 = vadd.f32 %v1650_v14, %v1649_v12  ;;  %v1605_v16 = vpop.f32.mrf.mxu1 }
 0x7e6   : >> { %v1655_v17 = vadd.f32 %v2202_v13, %v1651_v15 }
 0x7e7   : >> { %v1643_v18 = vpop.f32.mrf.mxu3 }
 0x7e8   : >> { %v1624_v19 = vpop.f32.mrf.mxu2  ;;  %v1656_v20 = vadd.f32 %v1655_v17, %v2858_v37  ;;  %v2068_v37 = vld [vmem:[%s1682_s28 + $0x8] sm:$0xff]  ;;  %s1804_s28 = scalar_lea.sflag (%p470_p1), [#allocation4], %s2691_s5 }
 0x7e9   : >> { %1713 = vmatpush.bf16.msra.mxu0 %v2068_v37 }
 0x7ea   : >> { %v1657_v21 = vsel %vm555_vm0, %v1656_v20, 0.0 }
 0x7eb   : >> { %1658 = vadd.xlane.f32.xlu0 %v1657_v21 }
 0x7ed   : >> { %1714 = vmatpush.bf16.msra.mxu0 %v2067_v27 }
 0x85e   : >> { %v1659_v22 = vpop.xlane.xlu0 %1658 }
 0x85f   : >> { %v1660_v23 = vmul.f32 %v1659_v22, %v2837_v6 }
 0x861   : >> { %v1661_v24 = vsub.f32 %v1656_v20, %v1660_v23 }
 0x863   : >> { %v1662_v25 = vmul.f32 %v1661_v24, %v1661_v24 }
 0x865   : >> { %v1663_v26 = vsel %vm555_vm0, %v1662_v25, 0.0 }
 0x866   : >> { %1664 = vadd.xlane.f32.xlu1 %v1663_v26 }
 0x8d9   : >> { %v1665_v30 = vpop.xlane.xlu1 %1664 }
 0x8da   : >> { %v1666_v31 = vmul.f32 %v1665_v30, %v2837_v6 }
 0x8dc   : >> { %v1667_v32 = vadd.f32 1e-05, %v1666_v31 }
 0x8de   : >> { %2241 = vrsqrt.f32 %v1667_v32  ;;  %vm1674_vm8 = vweird.f32 %v1667_v32 }
 0x8e4   : >> { %v2242_v33 = vpop.eup %2241 }
 0x8e5   : >> { %v1669_v34 = vmul.f32 %v2242_v33, %v1667_v32  ;;  %vm1675_vm7 = vweird.f32 %v2242_v33 }
 0x8e6   : >> { %vm1676_vm9 = vmor %vm1674_vm8, %vm1675_vm7 }
 0x8e7   : >> { %v1670_v35 = vmul.f32 %v2242_v33, %v1669_v34 }
 0x8e9   : >> { %v1671_v36 = vmul.f32 0.5, %v1670_v35 }
 0x8eb   : >> { %v1672_v38 = vsub.f32 1.5, %v1671_v36 }
 0x8ed   : >> { %v1673_v39 = vmul.f32 %v2242_v33, %v1672_v38 }
 0x8ef   : >> { %v1677_v40 = vsel %vm1676_vm9, %v2242_v33, %v1673_v39 }
 0x8f0   : >> { %v1678_v41 = vmul.f32 %v1677_v40, %v1661_v24 }
 0x8f2   : >> { %v1679_v42 = vpack.c.bf16 %v1678_v41, %v1678_v41 }
 0x8f4   : >> { %2041 = vmatmul.msk.bf16.vlgmr.msra.gmra.mxu0 %vm555_vm0, %v1679_v42 }
 0x971   : >> { %v1716_v46 = vpop.f32.mrf.mxu0 }
 0x972   : >> { %v1717_v47 = vadd.f32 %v2203_v45, %v1716_v46 }
 0x974   : >> { %v1720_v48 = vmax.f32 %v1717_v47, 0.0 }
 0x976   : >> { %v1721_v49 = vpack.c.bf16 %v1720_v48, %v1720_v48 }
 0x978   : >> { %2059 = vmatmul.msk.bf16.vlgmr.msra.gmra.mxu1 %vm1761_vm10, %v1721_v49 }
 0x979   : >> { %v1718_v50 = vpop.f32.mrf.mxu0 }
 0x9f5   : >> { %v1774_v52 = vpop.f32.mrf.mxu1 }
 0x9f6   : >> { %v1775_v53 = vadd.f32 %v2204_v51, %v1774_v52 }
 0x9f8   : >> { %v1778_v54 = vadd.f32 %v1775_v53, %v1678_v41 }
 0x9fa   : >> { %v1779_v55 = vsel %vm555_vm0, %v1778_v54, 0.0 }
 0x9fb   : >> { %1780 = vadd.xlane.f32.xlu2 %v1779_v55 }
 0x9fd   : >> { %v1776_v56 = vpop.f32.mrf.mxu1 }
 0xa6e   : >> { %v1781_v57 = vpop.xlane.xlu2 %1780 }
 0xa6f   : >> { %v1782_v58 = vmul.f32 %v1781_v57, %v2837_v6 }
 0xa71   : >> { %v1783_v59 = vsub.f32 %v1778_v54, %v1782_v58 }
 0xa73   : >> { %v1784_v60 = vmul.f32 %v1783_v59, %v1783_v59 }
 0xa75   : >> { %v1785_v61 = vsel %vm555_vm0, %v1784_v60, 0.0 }
 0xa76   : >> { %1786 = vadd.xlane.f32.xlu0 %v1785_v61 }
 0xae9   : >> { %v1787_v62 = vpop.xlane.xlu0 %1786 }
 0xaea   : >> { %v1788_v63 = vmul.f32 %v1787_v62, %v2837_v6 }
 0xaec   : >> { %v1789_v2 = vadd.f32 1e-05, %v1788_v63 }
 0xaee   : >> { %2243 = vrsqrt.f32 %v1789_v2  ;;  %vm1796_vm12 = vweird.f32 %v1789_v2 }
 0xaf4   : >> { %v2244_v3 = vpop.eup %2243 }
 0xaf5   : >> { %v1791_v4 = vmul.f32 %v2244_v3, %v1789_v2  ;;  %vm1797_vm11 = vweird.f32 %v2244_v3 }
 0xaf6   : >> { %vm1798_vm13 = vmor %vm1796_vm12, %vm1797_vm11 }
 0xaf7   : >> { %v1792_v5 = vmul.f32 %v2244_v3, %v1791_v4 }
 0xaf9   : >> { %v1793_v7 = vmul.f32 0.5, %v1792_v5 }
 0xafb   : >> { %v1794_v1 = vsub.f32 1.5, %v1793_v7 }
 0xafd   : >> { %v1795_v8 = vmul.f32 %v2244_v3, %v1794_v1 }
 0xafe   : > { %472 = sbr.rel (!%p470_p1) target bundleno = 87 (0x57), region = 145 }
 0xaff   : >> { %v1799_v9 = vsel %vm1798_vm13, %v2244_v3, %v1795_v8 }
 0xb00   : >> { %v1800_v10 = vmul.f32 %v1799_v9, %v1783_v59  }
 0xb02   : >> { %v3052_v1 = vmov %v1800_v10  ;;  %1802 = vst.msk [vmem:[%s2715_s30] sm:$0xff] (%p470_p1), %vm555_vm0, %v1800_v10 }
 0xb03   : > { %2422 = shalt.err (!%p2419_p10)
}
 0xb04   : > { %2090 = dma.vmem_to_hbm [thread:$0]  (%p2634_p0), %s1817_s21, 128, %s1819_s17, %s1804_s28  }
 0xb05 PF: > { %s3055_s5 = sld [smem:[#allocation17_spill]]  ;;  %p3057_p11 = scmp.ge.s32.totalorder %s2481_s16, 2 }
 0xb07   : > { %p2110_p12 = pnand %p3057_p11, %p2642_p6 }
 0xb09   : > { %p2111_p2 = pneg %p2110_p12 }
 0xb0b   : > { %s1830_s3 = sand.u32 1, %s3055_s5  }
 0xb0c   : > { %s1831_s15 = scalar_lea.sflag [#allocation4], %s1830_s3 }
 0xb0d   : > { %2464 = dma.done.wait (%p2111_p2), %s1831_s15, 128  }
 0xb0e   : > { %2466 = vsyncadd (%p2111_p2), %s1831_s15, 4294967168  ;;  %s3058_s16 = sld [smem:[#allocation19_spill]]  ;;  %s3061_s13 = smov %s2473_s14 }
 0xb0f   : > { %s3059_s29 = sld [smem:[#allocation18_spill]] }
 0xb10   : > { %s3060_s15 = sld [smem:[#allocation20_spill]] }
 0xb14   : > { %p27_p4 = scmp.ge.s32.totalorder %s3058_s16, 4  }
 0xb15   : > { %s3062_s14 = smov %s3059_s29 }
 0xb16   :  { %29 = sbr.rel (!%p27_p4) target bundleno = 13 (0xd), region = 156 }
 0xb1b   :  { %1837 = vsyncpa [#allocation3], 1 }
 0xb1c   :  { %1839 = vsyncpa [#allocation3 + $0x1], 1 }
 0xb1d   :  { %1840 = vsyncpa [#allocation6], 1 }
 0xb1e   :  { %1842 = vsyncpa [#allocation6 + $0x1], 1 }
 0xb1f   :  { %1843 = vsyncpa [#allocation9], 1 }
 0xb20   :  { %1844 = vsyncpa [#allocation4], 1 }
 0xb21   :  { %1846 = vsyncpa [#allocation4 + $0x1], 1 }

</bundles_post_ra>
